<compile_context>
chip_gen: v6e
topology: v6e:2x2x1
jax: 0.10.0
libtpu: 0.0.40
codegen_flags: <defaults>
</compile_context>

<pallas_src>
import jax
import jax.numpy as jnp
from jax.experimental import pallas as pl
from jax.experimental.pallas import tpu as pltpu


def tmr_re_kernel(
    pos1_ref, pos2_ref,      # SMEM scalar-prefetch (B,1) int32 entity positions
    text_hbm,                # HBM  (B,L,Hb)  BERT last_hidden_state (never copied wholesale)
    pic_ref,                 # VMEM (TB,PD)   spatially-summed resnet features (compute dtype)
    phr_ref,                 # VMEM (TB,Hb)   token-summed phrase hidden states
    hdes_ref,                # VMEM (TB,Hb)   pooled head-entity description
    tdes_ref,                # VMEM (TB,Hb)   pooled tail-entity description
    w_pic_ref,               # (PD,HS)  linear_pic weight      (resident)
    w_q_ref,                 # (Hb,Hb)  linear_q_entity weight (resident)
    w_ph_ref,                # (Hb,HS)  linear_phrases weight  (resident)
    w_f_ref,                 # (4*Hb+2*HS, HS) linear_final weight (resident, sliced as K-slabs)
    b_fused_ref,             # (1,HS) f32: every bias folded through w_f
    out_ref,                 # (TB,HS) f32 output tile
    ent_buf,                 # VMEM scratch (2*TB,Hb): gathered head rows then tail rows
    dma_sem,                 # ONE shared DMA semaphore for all gathers of this tile
):
    f32 = jnp.float32
    cdt = w_f_ref.dtype                      # compute (MXU) dtype
    TB, HS = out_ref.shape
    Hb = w_q_ref.shape[0]
    L = text_hbm.shape[1]
    base = pl.program_id(0) * TB

    # ---- 1) issue 2*TB entity-row gathers from HBM against ONE shared sem ----
    # All SMEM scalar reads happen before the single .wait() below (keeps
    # sst->sld forwarding).  Positions are clamped defensively to L-1.
    for b in range(TB):
        p1 = jnp.minimum(pos1_ref[base + b, 0], L - 1)
        p2 = jnp.minimum(pos2_ref[base + b, 0], L - 1)
        pltpu.make_async_copy(text_hbm.at[base + b, pl.ds(p1, 1), :],
                              ent_buf.at[pl.ds(b, 1), :],
                              dma_sem.at[0]).start()
        pltpu.make_async_copy(text_hbm.at[base + b, pl.ds(p2, 1), :],
                              ent_buf.at[pl.ds(TB + b, 1), :],
                              dma_sem.at[0]).start()

    # ---- 2) branch matmuls while the gathers are in flight (f32 accumulation) ----
    q_h = jnp.dot(hdes_ref[...], w_q_ref[...], preferred_element_type=f32)      # (TB,Hb)
    q_t = jnp.dot(tdes_ref[...], w_q_ref[...], preferred_element_type=f32)      # (TB,Hb)
    phrases = jnp.dot(phr_ref[...], w_ph_ref[...], preferred_element_type=f32)  # (TB,HS)
    pic = jnp.dot(pic_ref[...], w_pic_ref[...], preferred_element_type=f32)     # (TB,HS)

    # ---- 3) final projection as accumulated K-slab dots (no concat scratch) ----
    # Slab order follows the module's concat: [head, tail, phrases, pic, q_h, q_t].
    o1, o2, o3, o4, o5 = Hb, 2 * Hb, 2 * Hb + HS, 2 * Hb + 2 * HS, 3 * Hb + 2 * HS
    acc = jnp.dot(phrases.astype(cdt), w_f_ref[o2:o3, :], preferred_element_type=f32)
    acc += jnp.dot(pic.astype(cdt),     w_f_ref[o3:o4, :], preferred_element_type=f32)
    acc += jnp.dot(q_h.astype(cdt),     w_f_ref[o4:o5, :], preferred_element_type=f32)
    acc += jnp.dot(q_t.astype(cdt),     w_f_ref[o5:o5 + Hb, :], preferred_element_type=f32)

    # ---- 4) single aggregated wait for all gathers, then head/tail slabs ----
    # The DMA sem counts bytes; ent_buf covers exactly the 2*TB rows copied above.
    pltpu.make_async_copy(ent_buf, ent_buf, dma_sem.at[0]).wait()
    ent = ent_buf[...].astype(f32)
    head = (ent[:TB] + q_h).astype(cdt)      # head_hidden + hidden_q_h_des (bias in fused bias)
    tail = (ent[TB:] + q_t).astype(cdt)      # tail_hidden + hidden_q_t_des
    acc += jnp.dot(head, w_f_ref[0:o1, :], preferred_element_type=f32)
    acc += jnp.dot(tail, w_f_ref[o1:o2, :], preferred_element_type=f32)

    out_ref[...] = (acc + b_fused_ref[...]).astype(out_ref.dtype)


def tmr_re_forward(pos1, pos2, pic_feat, hidden_text, hidden_phrases,
                   hidden_h_des, hidden_t_des, params,
                   compute_dtype=jnp.bfloat16, batch_tile=128):
    """Wrapper: pre-reduces big activations, folds biases, calls the kernel."""
    B, L, Hb = hidden_text.shape
    P, PD = pic_feat.shape[1], pic_feat.shape[2]
    HS = params["w_pic"].shape[-1]
    CAT = 4 * Hb + 2 * HS
    assert Hb % 128 == 0 and HS % 128 == 0 and PD % 128 == 0, \
        "feature dims must be lane-aligned (128)"

    TB = B if B <= batch_tile else batch_tile
    assert B % TB == 0, "pad the batch to a multiple of the batch tile"
    if TB < B:
        assert TB % 8 == 0, "batch tile must be sublane-aligned when blocking"

    f32 = jnp.float32
    cdt = compute_dtype

    # Pre-reduce the two big activation tensors in XLA (trivially fusable into
    # the backbone epilogues) with f32 accumulation, then cast to the MXU dtype.
    pic_sum = jnp.sum(pic_feat.astype(f32), axis=1).astype(cdt)         # (B, PD)
    phr_sum = jnp.sum(hidden_phrases.astype(f32), axis=1).astype(cdt)   # (B, Hb)
    hdes = hidden_h_des.astype(cdt)
    tdes = hidden_t_des.astype(cdt)

    # Fold every bias into a single (1,HS) f32 vector (exact algebra):
    #   out = cat_nobias @ W_f + (bias_cat @ W_f + b_f)
    # bias_cat follows the concat order: [b_q, b_q, b_ph, P*b_pic, b_q, b_q].
    bias_cat = jnp.concatenate(
        [params["b_q"], params["b_q"], params["b_ph"],
         float(P) * params["b_pic"], params["b_q"], params["b_q"]],
        axis=-1).astype(f32)                                            # (1, CAT)
    b_fused = bias_cat @ params["w_f"].astype(f32) + params["b_f"].astype(f32)

    w_pic = params["w_pic"].astype(cdt)
    w_q = params["w_q"].astype(cdt)
    w_ph = params["w_ph"].astype(cdt)
    w_f = params["w_f"].astype(cdt)

    pos1 = pos1.astype(jnp.int32)
    pos2 = pos2.astype(jnp.int32)

    idx_b = lambda i, p1, p2: (i, 0)     # batch-blocked activations / output
    idx_w = lambda i, p1, p2: (0, 0)     # resident weights
    in_specs = [
        pl.BlockSpec(memory_space=pl.ANY),   # hidden_text stays in HBM; kernel DMAs rows
        pl.BlockSpec((TB, PD), idx_b),       # pic_sum
        pl.BlockSpec((TB, Hb), idx_b),       # phr_sum
        pl.BlockSpec((TB, Hb), idx_b),       # hdes
        pl.BlockSpec((TB, Hb), idx_b),       # tdes
        pl.BlockSpec((PD, HS), idx_w),       # w_pic
        pl.BlockSpec((Hb, Hb), idx_w),       # w_q
        pl.BlockSpec((Hb, HS), idx_w),       # w_ph
        pl.BlockSpec((CAT, HS), idx_w),      # w_f (sliced as K-slabs in-kernel)
        pl.BlockSpec((1, HS), idx_w),        # fused bias
    ]
    out_spec = pl.BlockSpec((TB, HS), idx_b)

    # VMEM budget: resident weights + double-buffered activation/output tiles
    # + gather scratch + headroom.
    itm = jnp.dtype(cdt).itemsize
    text_itm = hidden_text.dtype.itemsize
    w_bytes = (PD * HS + Hb * Hb + Hb * HS + CAT * HS) * itm + HS * 4
    act_tile = (TB * PD + 3 * TB * Hb) * itm
    out_tile = TB * HS * 4
    scratch_bytes = 2 * TB * Hb * text_itm
    vmem_limit = int(min(128 << 20,
                         max(32 << 20,
                             w_bytes + 2 * (act_tile + out_tile)
                             + scratch_bytes + (8 << 20))))

    flops = 2 * B * (PD * HS + Hb * HS + 2 * Hb * Hb + CAT * HS)
    bytes_accessed = ((B * PD + 3 * B * Hb) * itm       # pre-reduced activations
                      + 2 * B * Hb * text_itm           # gathered entity rows only
                      + w_bytes + B * HS * 4 + 8 * B)   # weights/bias, output, positions

    return pl.pallas_call(
        tmr_re_kernel,
        out_shape=jax.ShapeDtypeStruct((B, HS), jnp.float32),
        grid_spec=pltpu.PrefetchScalarGridSpec(
            num_scalar_prefetch=2,                 # pos1, pos2 -> SMEM
            grid=(B // TB,),
            in_specs=in_specs,
            out_specs=out_spec,
            scratch_shapes=[
                pltpu.VMEM((2 * TB, Hb), hidden_text.dtype),  # gathered entity rows
                pltpu.SemaphoreType.DMA((1,)),                # ONE shared gather sem
            ]),
        compiler_params=pltpu.CompilerParams(
            dimension_semantics=("parallel",),     # batch tiles across v7x TCs
            vmem_limit_bytes=vmem_limit),
        cost_estimate=pl.CostEstimate(flops=int(flops), transcendentals=0,
                                      bytes_accessed=int(bytes_accessed)),
    )(pos1, pos2, hidden_text, pic_sum, phr_sum, hdes, tdes,
      w_pic, w_q, w_ph, w_f, b_fused)


def tmr_re_reference(pos1, pos2, pic_feat, hidden_text, hidden_phrases,
                     hidden_h_des, hidden_t_des, params):
    """Plain-JAX f32 reference mirroring the PyTorch forward exactly."""
    pic = pic_feat @ params["w_pic"] + params["b_pic"]          # (B,P,HS)
    pic_ori_ = pic.sum(axis=1)                                  # (B,HS)
    q_h = hidden_h_des @ params["w_q"] + params["b_q"]
    q_t = hidden_t_des @ params["w_q"] + params["b_q"]
    phrases = hidden_phrases.sum(axis=1) @ params["w_ph"] + params["b_ph"]
    L = hidden_text.shape[1]
    onehot_h = jax.nn.one_hot(pos1[:, 0], L, dtype=jnp.float32)
    onehot_t = jax.nn.one_hot(pos2[:, 0], L, dtype=jnp.float32)
    head = (onehot_h[:, :, None] * hidden_text).sum(1) + q_h
    tail = (onehot_t[:, :, None] * hidden_text).sum(1) + q_t
    x = jnp.concatenate([head, tail, phrases, pic_ori_, q_h, q_t], axis=-1)
    return x @ params["w_f"] + params["b_f"]


if __name__ == "__main__":
    # Small shapes consistent with the module structure (real model:
    # Hb=768, HS=1536, PD=2048, P=49, L=max_length).
    B, L, Lp, P = 2, 8, 4, 49
    Hb, HS, PD = 128, 256, 256

    key = jax.random.PRNGKey(0)
    ks = jax.random.split(key, 16)

    # "Backbone" features (stand-ins for resnet50 / BERT outputs).
    pic_feat = jax.random.normal(ks[0], (B, P, PD), jnp.float32)
    hidden_text = jax.random.normal(ks[1], (B, L, Hb), jnp.float32)
    hidden_phrases = jax.random.normal(ks[2], (B, Lp, Hb), jnp.float32)
    hidden_h_des = jax.random.normal(ks[3], (B, Hb), jnp.float32)
    hidden_t_des = jax.random.normal(ks[4], (B, Hb), jnp.float32)
    pos1 = jax.random.randint(ks[5], (B, 1), 0, L, jnp.int32)
    pos2 = jax.random.randint(ks[6], (B, 1), 0, L, jnp.int32)

    std = 0.05
    params = {
        "w_pic": std * jax.random.normal(ks[7], (PD, HS), jnp.float32),
        "b_pic": std * jax.random.normal(ks[11], (1, HS), jnp.float32),
        "w_q":   std * jax.random.normal(ks[8], (Hb, Hb), jnp.float32),
        "b_q":   std * jax.random.normal(ks[12], (1, Hb), jnp.float32),
        "w_ph":  std * jax.random.normal(ks[9], (Hb, HS), jnp.float32),
        "b_ph":  std * jax.random.normal(ks[13], (1, HS), jnp.float32),
        "w_f":   std * jax.random.normal(ks[10], (4 * Hb + 2 * HS, HS), jnp.float32),
        "b_f":   std * jax.random.normal(ks[14], (1, HS), jnp.float32),
    }

    ref = tmr_re_reference(pos1, pos2, pic_feat, hidden_text, hidden_phrases,
                           hidden_h_des, hidden_t_des, params)

    # 1) f32 compute path: exact-algebra check against the PyTorch-equivalent ref.
    out32 = jax.block_until_ready(
        tmr_re_forward(pos1, pos2, pic_feat, hidden_text, hidden_phrases,
                       hidden_h_des, hidden_t_des, params,
                       compute_dtype=jnp.float32))
    assert out32.shape == (B, HS)
    assert jnp.allclose(out32, ref, rtol=1e-4, atol=1e-3), "f32 mismatch vs reference"

    # 2) bf16 compute path (production default): quantization-limited tolerance.
    out16 = jax.block_until_ready(
        tmr_re_forward(pos1, pos2, pic_feat, hidden_text, hidden_phrases,
                       hidden_h_des, hidden_t_des, params,
                       compute_dtype=jnp.bfloat16))
    assert out16.shape == (B, HS)
    assert jnp.allclose(out16, ref, rtol=5e-2, atol=2e-1), "bf16 mismatch vs reference"

    print("KERNEL_OK")
</pallas_src>

<mosaic_0001>
module attributes {stable_mosaic.version = 11 : i64} {
  func.func @tmr_re_kernel(%arg0: i32, %arg1: memref<2x1xi32, #tpu.memory_space<smem>>, %arg2: memref<2x1xi32, #tpu.memory_space<smem>>, %arg3: memref<2x8x128xf32, #tpu.memory_space<any>>, %arg4: memref<2x256xf32, #tpu.memory_space<vmem>>, %arg5: memref<2x128xf32, #tpu.memory_space<vmem>>, %arg6: memref<2x128xf32, #tpu.memory_space<vmem>>, %arg7: memref<2x128xf32, #tpu.memory_space<vmem>>, %arg8: memref<256x256xf32, #tpu.memory_space<vmem>>, %arg9: memref<128x128xf32, #tpu.memory_space<vmem>>, %arg10: memref<128x256xf32, #tpu.memory_space<vmem>>, %arg11: memref<1024x256xf32, #tpu.memory_space<vmem>>, %arg12: memref<1x256xf32, #tpu.memory_space<vmem>>, %arg13: memref<2x256xf32, #tpu.memory_space<vmem>>, %arg14: memref<4x128xf32, #tpu.memory_space<vmem>>, %arg15: memref<1x!tpu.dma_semaphore, #tpu.memory_space<semaphore_mem>>) attributes {dimension_semantics = [#tpu.dimension_semantics<parallel>], iteration_bounds = array<i64: 1>, scalar_prefetch = 2 : i64, scratch_operands = 2 : i64, tpu.core_type = #tpu.core_type<tc>, window_params = [{}, {transform_indices = @transform_1, window_bounds = array<i64: 2, 256>}, {transform_indices = @transform_2, window_bounds = array<i64: 2, 128>}, {transform_indices = @transform_3, window_bounds = array<i64: 2, 128>}, {transform_indices = @transform_4, window_bounds = array<i64: 2, 128>}, {pipeline_mode = #tpu.pipeline_mode<synchronous>, transform_indices = @transform_5, window_bounds = array<i64: 256, 256>}, {pipeline_mode = #tpu.pipeline_mode<synchronous>, transform_indices = @transform_6, window_bounds = array<i64: 128, 128>}, {pipeline_mode = #tpu.pipeline_mode<synchronous>, transform_indices = @transform_7, window_bounds = array<i64: 128, 256>}, {pipeline_mode = #tpu.pipeline_mode<synchronous>, transform_indices = @transform_8, window_bounds = array<i64: 1024, 256>}, {pipeline_mode = #tpu.pipeline_mode<synchronous>, transform_indices = @transform_9, window_bounds = array<i64: 1, 256>}, {transform_indices = @transform_10, window_bounds = array<i64: 2, 256>}]} {
    %c2_i32 = arith.constant 2 : i32
    %0 = arith.muli %arg0, %c2_i32 : i32
    %c0_i32 = arith.constant 0 : i32
    %1 = arith.addi %0, %c0_i32 : i32
    %2 = arith.index_cast %1 : i32 to index
    %c0 = arith.constant 0 : index
    %3 = memref.load %arg1[%2, %c0] : memref<2x1xi32, #tpu.memory_space<smem>>
    %c7_i32 = arith.constant 7 : i32
    %4 = arith.minsi %3, %c7_i32 : i32
    %c0_i32_0 = arith.constant 0 : i32
    %5 = arith.addi %0, %c0_i32_0 : i32
    %6 = arith.index_cast %5 : i32 to index
    %c0_1 = arith.constant 0 : index
    %7 = memref.load %arg2[%6, %c0_1] : memref<2x1xi32, #tpu.memory_space<smem>>
    %c7_i32_2 = arith.constant 7 : i32
    %8 = arith.minsi %7, %c7_i32_2 : i32
    %c0_i32_3 = arith.constant 0 : i32
    %9 = arith.addi %0, %c0_i32_3 : i32
    %c0_i32_4 = arith.constant 0 : i32
    %c0_i32_5 = arith.constant 0 : i32
    %10 = tpu.memref_slice %arg3[%9, %4, %c0_i32_5] : memref<2x8x128xf32, #tpu.memory_space<any>> -> memref<1x1x128xf32, #tpu.memory_space<any>>
    %11 = tpu.memref_squeeze %10 : memref<1x1x128xf32, #tpu.memory_space<any>> -> memref<1x128xf32, #tpu.memory_space<any>>
    %c0_i32_6 = arith.constant 0 : i32
    %c0_i32_7 = arith.constant 0 : i32
    %12 = tpu.memref_slice %arg14[%c0_i32_6, %c0_i32_7] : memref<4x128xf32, #tpu.memory_space<vmem>> -> memref<1x128xf32, #tpu.memory_space<vmem>>
    %13 = tpu.memref_slice %arg15[%c0_i32_4] : memref<1x!tpu.dma_semaphore, #tpu.memory_space<semaphore_mem>> -> memref<1x!tpu.dma_semaphore, #tpu.memory_space<semaphore_mem>>
    %14 = tpu.memref_squeeze %13 : memref<1x!tpu.dma_semaphore, #tpu.memory_space<semaphore_mem>> -> memref<!tpu.dma_semaphore, #tpu.memory_space<semaphore_mem>>
    tpu.enqueue_dma source(%11 : memref<1x128xf32, #tpu.memory_space<any>>) target(%12 : memref<1x128xf32, #tpu.memory_space<vmem>>) target_semaphore(%14 : memref<!tpu.dma_semaphore, #tpu.memory_space<semaphore_mem>>)
    %c0_i32_8 = arith.constant 0 : i32
    %15 = arith.addi %0, %c0_i32_8 : i32
    %c0_i32_9 = arith.constant 0 : i32
    %c0_i32_10 = arith.constant 0 : i32
    %16 = tpu.memref_slice %arg3[%15, %8, %c0_i32_10] : memref<2x8x128xf32, #tpu.memory_space<any>> -> memref<1x1x128xf32, #tpu.memory_space<any>>
    %17 = tpu.memref_squeeze %16 : memref<1x1x128xf32, #tpu.memory_space<any>> -> memref<1x128xf32, #tpu.memory_space<any>>
    %c2_i32_11 = arith.constant 2 : i32
    %c0_i32_12 = arith.constant 0 : i32
    %18 = tpu.memref_slice %arg14[%c2_i32_11, %c0_i32_12] : memref<4x128xf32, #tpu.memory_space<vmem>> -> memref<1x128xf32, #tpu.memory_space<vmem>>
    %19 = tpu.memref_slice %arg15[%c0_i32_9] : memref<1x!tpu.dma_semaphore, #tpu.memory_space<semaphore_mem>> -> memref<1x!tpu.dma_semaphore, #tpu.memory_space<semaphore_mem>>
    %20 = tpu.memref_squeeze %19 : memref<1x!tpu.dma_semaphore, #tpu.memory_space<semaphore_mem>> -> memref<!tpu.dma_semaphore, #tpu.memory_space<semaphore_mem>>
    tpu.enqueue_dma source(%17 : memref<1x128xf32, #tpu.memory_space<any>>) target(%18 : memref<1x128xf32, #tpu.memory_space<vmem>>) target_semaphore(%20 : memref<!tpu.dma_semaphore, #tpu.memory_space<semaphore_mem>>)
    %c1_i32 = arith.constant 1 : i32
    %21 = arith.addi %0, %c1_i32 : i32
    %22 = arith.index_cast %21 : i32 to index
    %c0_13 = arith.constant 0 : index
    %23 = memref.load %arg1[%22, %c0_13] : memref<2x1xi32, #tpu.memory_space<smem>>
    %c7_i32_14 = arith.constant 7 : i32
    %24 = arith.minsi %23, %c7_i32_14 : i32
    %c1_i32_15 = arith.constant 1 : i32
    %25 = arith.addi %0, %c1_i32_15 : i32
    %26 = arith.index_cast %25 : i32 to index
    %c0_16 = arith.constant 0 : index
    %27 = memref.load %arg2[%26, %c0_16] : memref<2x1xi32, #tpu.memory_space<smem>>
    %c7_i32_17 = arith.constant 7 : i32
    %28 = arith.minsi %27, %c7_i32_17 : i32
    %c1_i32_18 = arith.constant 1 : i32
    %29 = arith.addi %0, %c1_i32_18 : i32
    %c0_i32_19 = arith.constant 0 : i32
    %c0_i32_20 = arith.constant 0 : i32
    %30 = tpu.memref_slice %arg3[%29, %24, %c0_i32_20] : memref<2x8x128xf32, #tpu.memory_space<any>> -> memref<1x1x128xf32, #tpu.memory_space<any>>
    %31 = tpu.memref_squeeze %30 : memref<1x1x128xf32, #tpu.memory_space<any>> -> memref<1x128xf32, #tpu.memory_space<any>>
    %c1_i32_21 = arith.constant 1 : i32
    %c0_i32_22 = arith.constant 0 : i32
    %32 = tpu.memref_slice %arg14[%c1_i32_21, %c0_i32_22] : memref<4x128xf32, #tpu.memory_space<vmem>> -> memref<1x128xf32, #tpu.memory_space<vmem>>
    %33 = tpu.memref_slice %arg15[%c0_i32_19] : memref<1x!tpu.dma_semaphore, #tpu.memory_space<semaphore_mem>> -> memref<1x!tpu.dma_semaphore, #tpu.memory_space<semaphore_mem>>
    %34 = tpu.memref_squeeze %33 : memref<1x!tpu.dma_semaphore, #tpu.memory_space<semaphore_mem>> -> memref<!tpu.dma_semaphore, #tpu.memory_space<semaphore_mem>>
    tpu.enqueue_dma source(%31 : memref<1x128xf32, #tpu.memory_space<any>>) target(%32 : memref<1x128xf32, #tpu.memory_space<vmem>>) target_semaphore(%34 : memref<!tpu.dma_semaphore, #tpu.memory_space<semaphore_mem>>)
    %c1_i32_23 = arith.constant 1 : i32
    %35 = arith.addi %0, %c1_i32_23 : i32
    %c0_i32_24 = arith.constant 0 : i32
    %c0_i32_25 = arith.constant 0 : i32
    %36 = tpu.memref_slice %arg3[%35, %28, %c0_i32_25] : memref<2x8x128xf32, #tpu.memory_space<any>> -> memref<1x1x128xf32, #tpu.memory_space<any>>
    %37 = tpu.memref_squeeze %36 : memref<1x1x128xf32, #tpu.memory_space<any>> -> memref<1x128xf32, #tpu.memory_space<any>>
    %c3_i32 = arith.constant 3 : i32
    %c0_i32_26 = arith.constant 0 : i32
    %38 = tpu.memref_slice %arg14[%c3_i32, %c0_i32_26] : memref<4x128xf32, #tpu.memory_space<vmem>> -> memref<1x128xf32, #tpu.memory_space<vmem>>
    %39 = tpu.memref_slice %arg15[%c0_i32_24] : memref<1x!tpu.dma_semaphore, #tpu.memory_space<semaphore_mem>> -> memref<1x!tpu.dma_semaphore, #tpu.memory_space<semaphore_mem>>
    %40 = tpu.memref_squeeze %39 : memref<1x!tpu.dma_semaphore, #tpu.memory_space<semaphore_mem>> -> memref<!tpu.dma_semaphore, #tpu.memory_space<semaphore_mem>>
    tpu.enqueue_dma source(%37 : memref<1x128xf32, #tpu.memory_space<any>>) target(%38 : memref<1x128xf32, #tpu.memory_space<vmem>>) target_semaphore(%40 : memref<!tpu.dma_semaphore, #tpu.memory_space<semaphore_mem>>)
    %c0_27 = arith.constant 0 : index
    %c0_28 = arith.constant 0 : index
    %41 = vector.load %arg6[%c0_27, %c0_28] : memref<2x128xf32, #tpu.memory_space<vmem>>, vector<2x128xf32>
    %c0_29 = arith.constant 0 : index
    %c0_30 = arith.constant 0 : index
    %42 = vector.load %arg9[%c0_29, %c0_30] : memref<128x128xf32, #tpu.memory_space<vmem>>, vector<128x128xf32>
    %cst = arith.constant dense<0.000000e+00> : vector<2x128xf32>
    %43 = tpu.matmul %41, %42, %cst {dimension_numbers = #tpu.dot_dimension_numbers<[1], [0], [0], [1], [0, 0, 1, 1], [], []>} : vector<2x128xf32>, vector<128x128xf32>, vector<2x128xf32> -> vector<2x128xf32>
    %c0_31 = arith.constant 0 : index
    %c0_32 = arith.constant 0 : index
    %44 = vector.load %arg7[%c0_31, %c0_32] : memref<2x128xf32, #tpu.memory_space<vmem>>, vector<2x128xf32>
    %c0_33 = arith.constant 0 : index
    %c0_34 = arith.constant 0 : index
    %45 = vector.load %arg9[%c0_33, %c0_34] : memref<128x128xf32, #tpu.memory_space<vmem>>, vector<128x128xf32>
    %cst_35 = arith.constant dense<0.000000e+00> : vector<2x128xf32>
    %46 = tpu.matmul %44, %45, %cst_35 {dimension_numbers = #tpu.dot_dimension_numbers<[1], [0], [0], [1], [0, 0, 1, 1], [], []>} : vector<2x128xf32>, vector<128x128xf32>, vector<2x128xf32> -> vector<2x128xf32>
    %c0_36 = arith.constant 0 : index
    %c0_37 = arith.constant 0 : index
    %47 = vector.load %arg5[%c0_36, %c0_37] : memref<2x128xf32, #tpu.memory_space<vmem>>, vector<2x128xf32>
    %c0_38 = arith.constant 0 : index
    %c0_39 = arith.constant 0 : index
    %48 = vector.load %arg10[%c0_38, %c0_39] : memref<128x256xf32, #tpu.memory_space<vmem>>, vector<128x256xf32>
    %cst_40 = arith.constant dense<0.000000e+00> : vector<2x256xf32>
    %49 = tpu.matmul %47, %48, %cst_40 {dimension_numbers = #tpu.dot_dimension_numbers<[1], [0], [0], [1], [0, 0, 1, 1], [], []>} : vector<2x128xf32>, vector<128x256xf32>, vector<2x256xf32> -> vector<2x256xf32>
    %c0_41 = arith.constant 0 : index
    %c0_42 = arith.constant 0 : index
    %50 = vector.load %arg4[%c0_41, %c0_42] : memref<2x256xf32, #tpu.memory_space<vmem>>, vector<2x256xf32>
    %c0_43 = arith.constant 0 : index
    %c0_44 = arith.constant 0 : index
    %51 = vector.load %arg8[%c0_43, %c0_44] : memref<256x256xf32, #tpu.memory_space<vmem>>, vector<256x256xf32>
    %cst_45 = arith.constant dense<0.000000e+00> : vector<2x256xf32>
    %52 = tpu.matmul %50, %51, %cst_45 {dimension_numbers = #tpu.dot_dimension_numbers<[1], [0], [0], [1], [0, 0, 1, 1], [], []>} : vector<2x256xf32>, vector<256x256xf32>, vector<2x256xf32> -> vector<2x256xf32>
    %c256 = arith.constant 256 : index
    %c0_46 = arith.constant 0 : index
    %53 = vector.load %arg11[%c256, %c0_46] : memref<1024x256xf32, #tpu.memory_space<vmem>>, vector<256x256xf32>
    %cst_47 = arith.constant dense<0.000000e+00> : vector<2x256xf32>
    %54 = tpu.matmul %49, %53, %cst_47 {dimension_numbers = #tpu.dot_dimension_numbers<[1], [0], [0], [1], [0, 0, 1, 1], [], []>} : vector<2x256xf32>, vector<256x256xf32>, vector<2x256xf32> -> vector<2x256xf32>
    %c512 = arith.constant 512 : index
    %c0_48 = arith.constant 0 : index
    %55 = vector.load %arg11[%c512, %c0_48] : memref<1024x256xf32, #tpu.memory_space<vmem>>, vector<256x256xf32>
    %cst_49 = arith.constant dense<0.000000e+00> : vector<2x256xf32>
    %56 = tpu.matmul %52, %55, %cst_49 {dimension_numbers = #tpu.dot_dimension_numbers<[1], [0], [0], [1], [0, 0, 1, 1], [], []>} : vector<2x256xf32>, vector<256x256xf32>, vector<2x256xf32> -> vector<2x256xf32>
    %57 = arith.addf %54, %56 : vector<2x256xf32>
    %c768 = arith.constant 768 : index
    %c0_50 = arith.constant 0 : index
    %58 = vector.load %arg11[%c768, %c0_50] : memref<1024x256xf32, #tpu.memory_space<vmem>>, vector<128x256xf32>
    %cst_51 = arith.constant dense<0.000000e+00> : vector<2x256xf32>
    %59 = tpu.matmul %43, %58, %cst_51 {dimension_numbers = #tpu.dot_dimension_numbers<[1], [0], [0], [1], [0, 0, 1, 1], [], []>} : vector<2x128xf32>, vector<128x256xf32>, vector<2x256xf32> -> vector<2x256xf32>
    %60 = arith.addf %57, %59 : vector<2x256xf32>
    %c896 = arith.constant 896 : index
    %c0_52 = arith.constant 0 : index
    %61 = vector.load %arg11[%c896, %c0_52] : memref<1024x256xf32, #tpu.memory_space<vmem>>, vector<128x256xf32>
    %cst_53 = arith.constant dense<0.000000e+00> : vector<2x256xf32>
    %62 = tpu.matmul %46, %61, %cst_53 {dimension_numbers = #tpu.dot_dimension_numbers<[1], [0], [0], [1], [0, 0, 1, 1], [], []>} : vector<2x128xf32>, vector<128x256xf32>, vector<2x256xf32> -> vector<2x256xf32>
    %63 = arith.addf %60, %62 : vector<2x256xf32>
    %c0_i32_54 = arith.constant 0 : i32
    %64 = tpu.memref_slice %arg15[%c0_i32_54] : memref<1x!tpu.dma_semaphore, #tpu.memory_space<semaphore_mem>> -> memref<1x!tpu.dma_semaphore, #tpu.memory_space<semaphore_mem>>
    %65 = tpu.memref_squeeze %64 : memref<1x!tpu.dma_semaphore, #tpu.memory_space<semaphore_mem>> -> memref<!tpu.dma_semaphore, #tpu.memory_space<semaphore_mem>>
    tpu.wait_dma2 semaphore(%65 : memref<!tpu.dma_semaphore, #tpu.memory_space<semaphore_mem>>) src(%arg14 : memref<4x128xf32, #tpu.memory_space<vmem>>) dst(%arg14 : memref<4x128xf32, #tpu.memory_space<vmem>>)
    %c0_55 = arith.constant 0 : index
    %c0_56 = arith.constant 0 : index
    %66 = vector.load %arg14[%c0_55, %c0_56] : memref<4x128xf32, #tpu.memory_space<vmem>>, vector<4x128xf32>
    %67 = vector.extract_strided_slice %66 {offsets = [0, 0], sizes = [2, 128], strides = [1, 1]} : vector<4x128xf32> to vector<2x128xf32>
    %68 = arith.addf %67, %43 : vector<2x128xf32>
    %69 = vector.extract_strided_slice %66 {offsets = [2, 0], sizes = [2, 128], strides = [1, 1]} : vector<4x128xf32> to vector<2x128xf32>
    %70 = arith.addf %69, %46 : vector<2x128xf32>
    %c0_57 = arith.constant 0 : index
    %c0_58 = arith.constant 0 : index
    %71 = vector.load %arg11[%c0_57, %c0_58] : memref<1024x256xf32, #tpu.memory_space<vmem>>, vector<128x256xf32>
    %cst_59 = arith.constant dense<0.000000e+00> : vector<2x256xf32>
    %72 = tpu.matmul %68, %71, %cst_59 {dimension_numbers = #tpu.dot_dimension_numbers<[1], [0], [0], [1], [0, 0, 1, 1], [], []>} : vector<2x128xf32>, vector<128x256xf32>, vector<2x256xf32> -> vector<2x256xf32>
    %73 = arith.addf %63, %72 : vector<2x256xf32>
    %c128 = arith.constant 128 : index
    %c0_60 = arith.constant 0 : index
    %74 = vector.load %arg11[%c128, %c0_60] : memref<1024x256xf32, #tpu.memory_space<vmem>>, vector<128x256xf32>
    %cst_61 = arith.constant dense<0.000000e+00> : vector<2x256xf32>
    %75 = tpu.matmul %70, %74, %cst_61 {dimension_numbers = #tpu.dot_dimension_numbers<[1], [0], [0], [1], [0, 0, 1, 1], [], []>} : vector<2x128xf32>, vector<128x256xf32>, vector<2x256xf32> -> vector<2x256xf32>
    %76 = arith.addf %73, %75 : vector<2x256xf32>
    %c0_62 = arith.constant 0 : index
    %c0_63 = arith.constant 0 : index
    %77 = vector.load %arg12[%c0_62, %c0_63] : memref<1x256xf32, #tpu.memory_space<vmem>>, vector<1x256xf32>
    %78 = vector.broadcast %77 : vector<1x256xf32> to vector<2x256xf32>
    %79 = arith.addf %76, %78 : vector<2x256xf32>
    %c0_64 = arith.constant 0 : index
    %c0_65 = arith.constant 0 : index
    %80 = vector.load %arg13[%c0_64, %c0_65] : memref<2x256xf32, #tpu.memory_space<vmem>>, vector<2x256xf32>
    tpu.vector_store %arg13[%c0_64, %c0_65], %79 {strides = array<i32>} : memref<2x256xf32, #tpu.memory_space<vmem>>, vector<2x256xf32>,
    return
  }
  func.func @transform_1(%arg0: i32, %arg1: memref<2x1xi32, #tpu.memory_space<smem>>, %arg2: memref<2x1xi32, #tpu.memory_space<smem>>) -> (i32, i32) {
    %c0_i32 = arith.constant 0 : i32
    %c0_i32_0 = arith.constant 0 : i32
    return %arg0, %c0_i32 : i32, i32
  }
  func.func @transform_2(%arg0: i32, %arg1: memref<2x1xi32, #tpu.memory_space<smem>>, %arg2: memref<2x1xi32, #tpu.memory_space<smem>>) -> (i32, i32) {
    %c0_i32 = arith.constant 0 : i32
    %c0_i32_0 = arith.constant 0 : i32
    return %arg0, %c0_i32 : i32, i32
  }
  func.func @transform_3(%arg0: i32, %arg1: memref<2x1xi32, #tpu.memory_space<smem>>, %arg2: memref<2x1xi32, #tpu.memory_space<smem>>) -> (i32, i32) {
    %c0_i32 = arith.constant 0 : i32
    %c0_i32_0 = arith.constant 0 : i32
    return %arg0, %c0_i32 : i32, i32
  }
  func.func @transform_4(%arg0: i32, %arg1: memref<2x1xi32, #tpu.memory_space<smem>>, %arg2: memref<2x1xi32, #tpu.memory_space<smem>>) -> (i32, i32) {
    %c0_i32 = arith.constant 0 : i32
    %c0_i32_0 = arith.constant 0 : i32
    return %arg0, %c0_i32 : i32, i32
  }
  func.func @transform_5(%arg0: i32, %arg1: memref<2x1xi32, #tpu.memory_space<smem>>, %arg2: memref<2x1xi32, #tpu.memory_space<smem>>) -> (i32, i32) {
    %c0_i32 = arith.constant 0 : i32
    %c0_i32_0 = arith.constant 0 : i32
    %c0_i32_1 = arith.constant 0 : i32
    return %c0_i32, %c0_i32_0 : i32, i32
  }
  func.func @transform_6(%arg0: i32, %arg1: memref<2x1xi32, #tpu.memory_space<smem>>, %arg2: memref<2x1xi32, #tpu.memory_space<smem>>) -> (i32, i32) {
    %c0_i32 = arith.constant 0 : i32
    %c0_i32_0 = arith.constant 0 : i32
    %c0_i32_1 = arith.constant 0 : i32
    return %c0_i32, %c0_i32_0 : i32, i32
  }
  func.func @transform_7(%arg0: i32, %arg1: memref<2x1xi32, #tpu.memory_space<smem>>, %arg2: memref<2x1xi32, #tpu.memory_space<smem>>) -> (i32, i32) {
    %c0_i32 = arith.constant 0 : i32
    %c0_i32_0 = arith.constant 0 : i32
    %c0_i32_1 = arith.constant 0 : i32
    return %c0_i32, %c0_i32_0 : i32, i32
  }
  func.func @transform_8(%arg0: i32, %arg1: memref<2x1xi32, #tpu.memory_space<smem>>, %arg2: memref<2x1xi32, #tpu.memory_space<smem>>) -> (i32, i32) {
    %c0_i32 = arith.constant 0 : i32
    %c0_i32_0 = arith.constant 0 : i32
    %c0_i32_1 = arith.constant 0 : i32
    return %c0_i32, %c0_i32_0 : i32, i32
  }
  func.func @transform_9(%arg0: i32, %arg1: memref<2x1xi32, #tpu.memory_space<smem>>, %arg2: memref<2x1xi32, #tpu.memory_space<smem>>) -> (i32, i32) {
    %c0_i32 = arith.constant 0 : i32
    %c0_i32_0 = arith.constant 0 : i32
    %c0_i32_1 = arith.constant 0 : i32
    return %c0_i32, %c0_i32_0 : i32, i32
  }
  func.func @transform_10(%arg0: i32, %arg1: memref<2x1xi32, #tpu.memory_space<smem>>, %arg2: memref<2x1xi32, #tpu.memory_space<smem>>) -> (i32, i32) {
    %c0_i32 = arith.constant 0 : i32
    %c0_i32_0 = arith.constant 0 : i32
    return %arg0, %c0_i32 : i32, i32
  }
}

</mosaic_0001>

<bundles_post_ra>
// kernel: tpu_custom_call.1
= control target key start
LH: loop header
LB: loop body
LE: loop exit
PB: predicated region body
PF: predicated region fallthrough
CT: control target
= control target key end

     0   :  { %s1937_s0 = inlined_call_operand.vmem [shape: s32[2,1], index: 0, kind: input, shape index: {}]   ;;  %s1938_s2 = inlined_call_operand.hbm [shape: f32[2,8,128], index: 2, kind: input, shape index: {}]   ;;  %s1939_s3 = inlined_call_operand.vmem [shape: f32[2,256], index: 3, kind: input, shape index: {}]   ;;  %s1940_s4 = inlined_call_operand.vmem [shape: f32[2,128], index: 4, kind: input, shape index: {}]   ;;  %s1941_s5 = inlined_call_operand.vmem [shape: f32[2,128], index: 5, kind: input, shape index: {}]   ;;  %s1942_s6 = inlined_call_operand.vmem [shape: f32[2,128], index: 6, kind: input, shape index: {}]   ;;  %s1943_s7 = inlined_call_operand.hbm [shape: f32[256,256], index: 7, kind: input, shape index: {}]   ;;  %s1944_s8 = inlined_call_operand.hbm [shape: f32[128,128], index: 8, kind: input, shape index: {}]   ;;  %s1945_s9 = inlined_call_operand.hbm [shape: f32[128,256], index: 9, kind: input, shape index: {}]   ;;  %s1946_s10 = inlined_call_operand.hbm [shape: f32[1024,256], index: 10, kind: input, shape index: {}]   ;;  %s1947_s11 = inlined_call_operand.vmem [shape: f32[1,256], index: 11, kind: input, shape index: {}]   ;;  %s1948_s12 = inlined_call_operand.hbm [shape: f32[2,256], index: 12, kind: output, shape index: {}]   ;;  %s1949_s1 = inlined_call_operand.vmem [shape: s32[2,1], index: 1, kind: input, shape index: {}]  }
   0x1   :  { %s17_s23 = sshll.u32 %s1937_s0, 4  ;;  %s21_s26 = sshll.u32 %s1949_s1, 4  ;;  %s18_s23 = int_to_ptr.vmem [resolvable:$true] %s17_s23  ;;  %s22_s26 = int_to_ptr.vmem [resolvable:$true] %s21_s26 }
   0x2   :  { %s1478_s27 = scalar_lea.vmem %s18_s23, 32  ;;  %p1483_p1 = scmp.lt.s32.totalorder %s18_s23, %s18_s23 }
   0x3   :  { %p1479_p0 = scmp.ne.s32.totalorder %s18_s23, %s1478_s27  ;;  %p1484_p2 = scmp.lt.s32.totalorder %s1478_s27, %s1478_s27 }
   0x5   :  { %p1485_p3 = por %p1484_p2, %p1483_p1 }
   0x7   :  { %p1486_p4 = pnand %p1485_p3, %p1479_p0 }
   0x9   :  { %1489 = shalt.err (!%p1486_p4)  }
   0xa   :  { %s1704_s28 = smov [#allocation5]   ;;  %s1490_s29 = scalar_lea.vmem %s22_s26, 32 }
   0xb   :  { %20 = dma.vmem_to_smem %s18_s23, 32, %s1704_s28, [#allocation4] }
   0xc   :  { %p1491_p5 = scmp.ne.s32.totalorder %s22_s26, %s1490_s29  ;;  %p1495_p6 = scmp.lt.s32.totalorder %s22_s26, %s22_s26 }
   0xd   :  { %p1496_p7 = scmp.lt.s32.totalorder %s1490_s29, %s1490_s29 }
   0xf   :  { %p1497_p8 = por %p1496_p7, %p1495_p6 }
  0x11   :  { %p1498_p9 = pnand %p1497_p8, %p1491_p5 }
  0x13   :  { %1501 = shalt.err (!%p1498_p9)  }
  0x14   :  { %s1705_s0 = smov [#allocation6]  }
  0x15   :  { %24 = dma.vmem_to_smem %s22_s26, 32, %s1705_s0, [#allocation4] }
  0x16   :  { %1692 = dma.done.wait [#allocation4], 64 }
  0x17   :  { %1693 = vsyncadd [#allocation4], 4294967232 }
  0x18   :  { %26 = sfence }
  0x19   :  { %27 = vsyncpa [#allocation8], 0 }
  0x1a   :  { %28 = vsyncpa [#allocation11], 0 }
  0x1b   :  { %29 = vsyncpa [#allocation14], 0 }
  0x1c   :  { %30 = vsyncpa [#allocation9], 0  ;;  %s1706_s1 = smov [#allocation10]  }
  0x1d   :  { %s56_s30 = sshll.u32 %s1706_s1, 4  ;;  %s57_s30 = int_to_ptr.vmem [resolvable:$true] %s56_s30 }
  0x1e   :  { %s1510_s13 = scalar_lea.vmem %s57_s30, 2048  ;;  %p1515_p11 = scmp.lt.s32.totalorder %s57_s30, %s57_s30 }
  0x1f   :  { %p1511_p10 = scmp.ne.s32.totalorder %s57_s30, %s1510_s13  ;;  %p1516_p12 = scmp.lt.s32.totalorder %s1510_s13, %s1510_s13 }
  0x21   :  { %p1517_p13 = por %p1516_p12, %p1515_p11 }
  0x23   :  { %p1518_p0 = pnand %p1517_p13, %p1511_p10 }
  0x25   :  { %1521 = shalt.err (!%p1518_p0)
}
  0x26   :  { %s1707_s14 = smov 128   ;;  %s1708_s15 = smov 8  }
  0x27   :  { %62 = dma.hbm_to_vmem [thread:$0]  %s1944_s8, 2048, %s57_s30, [#allocation11], %s1707_s14, %s1707_s14, %s1708_s15  }
  0x28   :  { %s1709_s18 = smov [#allocation7]  }
  0x29   :  { %s44_s19 = sshll.u32 %s1709_s18, 4  ;;  %s45_s19 = int_to_ptr.vmem [resolvable:$true] %s44_s19 }
  0x2a   :  { %s1530_s20 = scalar_lea.vmem %s45_s19, 8192  ;;  %p1535_p2 = scmp.lt.s32.totalorder %s45_s19, %s45_s19 }
  0x2b   :  { %p1531_p1 = scmp.ne.s32.totalorder %s45_s19, %s1530_s20  ;;  %p1536_p3 = scmp.lt.s32.totalorder %s1530_s20, %s1530_s20 }
  0x2d   :  { %p1537_p4 = por %p1536_p3, %p1535_p2 }
  0x2f   :  { %p1538_p5 = pnand %p1537_p4, %p1531_p1 }
  0x31   :  { %1541 = shalt.err (!%p1538_p5)
}
  0x32   :  { %s1710_s21 = smov 256   ;;  %s1711_s22 = smov 16  }
  0x33   :  { %50 = dma.hbm_to_vmem [thread:$0]  %s1943_s7, 8192, %s45_s19, [#allocation8], %s1710_s21, %s1710_s21, %s1711_s22  }
  0x34   :  { %s1712_s25 = smov [#allocation12]   ;;  %s1713_s27 = smov [#allocation13]  }
  0x35   :  { %s68_s26 = sshll.u32 %s1712_s25, 4  ;;  %s80_s8 = sshll.u32 %s1713_s27, 4  ;;  %s69_s26 = int_to_ptr.vmem [resolvable:$true] %s68_s26  ;;  %s81_s8 = int_to_ptr.vmem [resolvable:$true] %s80_s8 }
  0x36   :  { %s1550_s28 = scalar_lea.vmem %s69_s26, 4096  ;;  %p1555_p7 = scmp.lt.s32.totalorder %s69_s26, %s69_s26 }
  0x37   :  { %p1551_p6 = scmp.ne.s32.totalorder %s69_s26, %s1550_s28  ;;  %p1556_p8 = scmp.lt.s32.totalorder %s1550_s28, %s1550_s28 }
  0x39   :  { %p1557_p9 = por %p1556_p8, %p1555_p7 }
  0x3b   :  { %p1558_p10 = pnand %p1557_p9, %p1551_p6 }
  0x3d   :  { %1561 = shalt.err (!%p1558_p10)
}
  0x3e   :  { %74 = dma.hbm_to_vmem [thread:$0]  %s1945_s9, 4096, %s69_s26, [#allocation11], %s1710_s21, %s1710_s21, %s1711_s22  }
  0x3f   :  { %s1570_s1 = scalar_lea.vmem %s81_s8, 32768  ;;  %p1575_p12 = scmp.lt.s32.totalorder %s81_s8, %s81_s8 }
  0x40   :  { %p1571_p11 = scmp.ne.s32.totalorder %s81_s8, %s1570_s1  ;;  %p1576_p13 = scmp.lt.s32.totalorder %s1570_s1, %s1570_s1 }
  0x42   :  { %p1577_p0 = por %p1576_p13, %p1575_p12 }
  0x44   :  { %p1578_p1 = pnand %p1577_p0, %p1571_p11 }
  0x46   :  { %1581 = shalt.err (!%p1578_p1)
}
  0x47   :  { %86 = dma.hbm_to_vmem [thread:$0]  %s1946_s10, 32768, %s81_s8, [#allocation14], %s1710_s21, %s1710_s21, %s1711_s22  }
  0x48   :  { %1694 = dma.done.wait [#allocation8], 8192  }
  0x49   :  { %1695 = vsyncadd [#allocation8], 4294959104 }
  0x4a   :  { %1696 = dma.done.wait [#allocation11], 6144  }
  0x4b   :  { %1697 = vsyncadd [#allocation11], 4294961152 }
  0x4c   :  { %1698 = dma.done.wait [#allocation14], 32768  }
  0x4d   :  { %1699 = vsyncadd [#allocation14], 4294934528  ;;  %v1714_v0 = vmov 0.0   ;;  %vm1715_vm0 = vmmov 0   ;;  %v194_v1 = vld [vmem:[#allocation10 + $0x78] sm:$0xff]  ;;  %v193_v2 = vld [vmem:[#allocation10 + $0x70] sm:$0xff] }
  0x4e   :  { %1426 = vmatprep.subr.mxu1 %v1714_v0  ;;  %1458 = vmatprep.mubr.msk.f32.mxu1 %vm1715_vm0, %v1714_v0  ;;  %v192_v3 = vld [vmem:[#allocation10 + $0x68] sm:$0xff]  ;;  %v191_v4 = vld [vmem:[#allocation10 + $0x60] sm:$0xff]  ;;  %v190_v5 = vld [vmem:[#allocation10 + $0x58] sm:$0xff]  ;;  %s1716_s16 = smov [#allocation2]   ;;  %s1872_s25 = scalar_lea.hbm %s1938_s2, 256 }
  0x4f   :  { %1391 = vmatprep.subr.mxu0 %v1714_v0  ;;  %1423 = vmatprep.mubr.msk.f32.mxu0 %vm1715_vm0, %v1714_v0  ;;  %v189_v6 = vld [vmem:[#allocation10 + $0x50] sm:$0xff]  ;;  %v188_v7 = vld [vmem:[#allocation10 + $0x48] sm:$0xff]  ;;  %v187_v8 = vld [vmem:[#allocation10 + $0x40] sm:$0xff]  ;;  %s120_s17 = sshll.u32 %s1716_s16, 4  ;;  %s1864_s17 = int_to_ptr.vmem [resolvable:$true] %s120_s17 }
  0x50   :  { %1427 = vmatpush3.msra.mxu1 %v194_v1  ;;  %1392 = vmatpush3.msra.mxu0 %v194_v1  ;;  %v186_v9 = vld [vmem:[#allocation10 + $0x38] sm:$0xff]  ;;  %v185_v10 = vld [vmem:[#allocation10 + $0x30] sm:$0xff]  ;;  %v184_v11 = vld [vmem:[#allocation10 + $0x28] sm:$0xff] }
  0x51   :  { %1428 = vmatprep.subr.mxu1 %v1714_v0  ;;  %1393 = vmatprep.subr.mxu0 %v1714_v0  ;;  %v183_v12 = vld [vmem:[#allocation10 + $0x20] sm:$0xff]  ;;  %v182_v13 = vld [vmem:[#allocation10 + $0x18] sm:$0xff]  ;;  %v181_v14 = vld [vmem:[#allocation10 + $0x10] sm:$0xff] }
  0x52   :  { %1429 = vmatpush3.msra.mxu1 %v193_v2  ;;  %1394 = vmatpush3.msra.mxu0 %v193_v2  ;;  %v180_v15 = vld [vmem:[#allocation10 + $0x8] sm:$0xff]  ;;  %v179_v16 = vld [vmem:[#allocation10] sm:$0xff]  ;;  %v265_v17 = vld [vmem:[%s1942_s6] sm:$0x3] }
  0x53   :  { %1430 = vmatprep.subr.mxu1 %v1714_v0  ;;  %1395 = vmatprep.subr.mxu0 %v1714_v0  ;;  %v472_v18 = vld [vmem:[#allocation7 + $0xf8] sm:$0xff]  ;;  %v471_v19 = vld [vmem:[#allocation7 + $0xf0] sm:$0xff]  ;;  %v470_v21 = vld [vmem:[#allocation7 + $0xe8] sm:$0xff] }
  0x54   :  { %1431 = vmatpush3.msra.mxu1 %v192_v3  ;;  %1396 = vmatpush3.msra.mxu0 %v192_v3  ;;  %v368_v20 = vld [vmem:[#allocation12 + $0xf8] sm:$0xff]  ;;  %v469_v23 = vld [vmem:[#allocation7 + $0xe0] sm:$0xff]  ;;  %v367_v24 = vld [vmem:[#allocation12 + $0xf0] sm:$0xff] }
  0x55   :  { %1432 = vmatprep.subr.mxu1 %v1714_v0  ;;  %1397 = vmatprep.subr.mxu0 %v1714_v0  ;;  %v178_v22 = vld [vmem:[%s1941_s5] sm:$0x3]  ;;  %v366_v26 = vld [vmem:[#allocation12 + $0xe8] sm:$0xff]  ;;  %v467_v27 = vld [vmem:[#allocation7 + $0xd0] sm:$0xff] }
  0x56   :  { %1433 = vmatpush3.msra.mxu1 %v191_v4  ;;  %1398 = vmatpush3.msra.mxu0 %v191_v4  ;;  %v468_v25 = vld [vmem:[#allocation7 + $0xd8] sm:$0xff]  ;;  %v365_v28 = vld [vmem:[#allocation12 + $0xe0] sm:$0xff]  ;;  %v466_v29 = vld [vmem:[#allocation7 + $0xc8] sm:$0xff] }
  0x57   :  { %1434 = vmatprep.subr.mxu1 %v1714_v0  ;;  %1399 = vmatprep.subr.mxu0 %v1714_v0  ;;  %v364_v30 = vld [vmem:[#allocation12 + $0xd8] sm:$0xff]  ;;  %v465_v31 = vld [vmem:[#allocation7 + $0xc0] sm:$0xff]  ;;  %v363_v32 = vld [vmem:[#allocation12 + $0xd0] sm:$0xff] }
  0x58   :  { %1435 = vmatpush3.msra.mxu1 %v190_v5  ;;  %1400 = vmatpush3.msra.mxu0 %v190_v5  ;;  %v464_v33 = vld [vmem:[#allocation7 + $0xb8] sm:$0xff]  ;;  %v362_v34 = vld [vmem:[#allocation12 + $0xc8] sm:$0xff]  ;;  %v463_v35 = vld [vmem:[#allocation7 + $0xb0] sm:$0xff] }
  0x59   :  { %1436 = vmatprep.subr.mxu1 %v1714_v0  ;;  %1401 = vmatprep.subr.mxu0 %v1714_v0  ;;  %v361_v36 = vld [vmem:[#allocation12 + $0xc0] sm:$0xff]  ;;  %v462_v37 = vld [vmem:[#allocation7 + $0xa8] sm:$0xff]  ;;  %v360_v38 = vld [vmem:[#allocation12 + $0xb8] sm:$0xff] }
  0x5a   :  { %1437 = vmatpush3.msra.mxu1 %v189_v6  ;;  %1402 = vmatpush3.msra.mxu0 %v189_v6  ;;  %v461_v39 = vld [vmem:[#allocation7 + $0xa0] sm:$0xff]  ;;  %v359_v40 = vld [vmem:[#allocation12 + $0xb0] sm:$0xff]  ;;  %v460_v41 = vld [vmem:[#allocation7 + $0x98] sm:$0xff] }
  0x5b   :  { %1438 = vmatprep.subr.mxu1 %v1714_v0  ;;  %1403 = vmatprep.subr.mxu0 %v1714_v0  ;;  %v358_v42 = vld [vmem:[#allocation12 + $0xa8] sm:$0xff]  ;;  %v459_v43 = vld [vmem:[#allocation7 + $0x90] sm:$0xff]  ;;  %v357_v44 = vld [vmem:[#allocation12 + $0xa0] sm:$0xff] }
  0x5c   :  { %1439 = vmatpush3.msra.mxu1 %v188_v7  ;;  %1404 = vmatpush3.msra.mxu0 %v188_v7  ;;  %v458_v45 = vld [vmem:[#allocation7 + $0x88] sm:$0xff]  ;;  %v356_v46 = vld [vmem:[#allocation12 + $0x98] sm:$0xff]  ;;  %v457_v47 = vld [vmem:[#allocation7 + $0x80] sm:$0xff] }
  0x5d   :  { %1440 = vmatprep.subr.mxu1 %v1714_v0  ;;  %1405 = vmatprep.subr.mxu0 %v1714_v0  ;;  %v355_v48 = vld [vmem:[#allocation12 + $0x90] sm:$0xff]  ;;  %v456_v49 = vld [vmem:[#allocation7 + $0x78] sm:$0xff]  ;;  %v354_v50 = vld [vmem:[#allocation12 + $0x88] sm:$0xff] }
  0x5e   :  { %1441 = vmatpush3.msra.mxu1 %v187_v8  ;;  %1406 = vmatpush3.msra.mxu0 %v187_v8  ;;  %v455_v51 = vld [vmem:[#allocation7 + $0x70] sm:$0xff]  ;;  %v353_v52 = vld [vmem:[#allocation12 + $0x80] sm:$0xff]  ;;  %v454_v53 = vld [vmem:[#allocation7 + $0x68] sm:$0xff] }
  0x5f   :  { %1442 = vmatprep.subr.mxu1 %v1714_v0  ;;  %1407 = vmatprep.subr.mxu0 %v1714_v0  ;;  %v352_v54 = vld [vmem:[#allocation12 + $0x78] sm:$0xff]  ;;  %v453_v55 = vld [vmem:[#allocation7 + $0x60] sm:$0xff]  ;;  %v351_v56 = vld [vmem:[#allocation12 + $0x70] sm:$0xff] }
  0x60   :  { %1443 = vmatpush3.msra.mxu1 %v186_v9  ;;  %1408 = vmatpush3.msra.mxu0 %v186_v9  ;;  %v452_v57 = vld [vmem:[#allocation7 + $0x58] sm:$0xff]  ;;  %v350_v58 = vld [vmem:[#allocation12 + $0x68] sm:$0xff]  ;;  %v451_v59 = vld [vmem:[#allocation7 + $0x50] sm:$0xff] }
  0x61   :  { %1444 = vmatprep.subr.mxu1 %v1714_v0  ;;  %1409 = vmatprep.subr.mxu0 %v1714_v0  ;;  %v349_v60 = vld [vmem:[#allocation12 + $0x60] sm:$0xff]  ;;  %v450_v61 = vld [vmem:[#allocation7 + $0x48] sm:$0xff]  ;;  %v348_v62 = vld [vmem:[#allocation12 + $0x58] sm:$0xff] }
  0x62   :  { %1445 = vmatpush3.msra.mxu1 %v185_v10  ;;  %1410 = vmatpush3.msra.mxu0 %v185_v10  ;;  %v449_v63 = vld [vmem:[#allocation7 + $0x40] sm:$0xff]  ;;  %v347_v1 = vld [vmem:[#allocation12 + $0x50] sm:$0xff]  ;;  %v448_v2 = vld [vmem:[#allocation7 + $0x38] sm:$0xff] }
  0x63   :  { %1446 = vmatprep.subr.mxu1 %v1714_v0  ;;  %1411 = vmatprep.subr.mxu0 %v1714_v0  ;;  %v346_v3 = vld [vmem:[#allocation12 + $0x48] sm:$0xff]  ;;  %v447_v4 = vld [vmem:[#allocation7 + $0x30] sm:$0xff]  ;;  %v345_v5 = vld [vmem:[#allocation12 + $0x40] sm:$0xff] }
  0x64   :  { %1447 = vmatpush3.msra.mxu1 %v184_v11  ;;  %1412 = vmatpush3.msra.mxu0 %v184_v11  ;;  %v446_v6 = vld [vmem:[#allocation7 + $0x28] sm:$0xff]  ;;  %v344_v7 = vld [vmem:[#allocation12 + $0x38] sm:$0xff]  ;;  %v445_v8 = vld [vmem:[#allocation7 + $0x20] sm:$0xff] }
  0x65   :  { %1448 = vmatprep.subr.mxu1 %v1714_v0  ;;  %1413 = vmatprep.subr.mxu0 %v1714_v0  ;;  %v343_v9 = vld [vmem:[#allocation12 + $0x30] sm:$0xff]  ;;  %v444_v10 = vld [vmem:[#allocation7 + $0x18] sm:$0xff]  ;;  %v342_v11 = vld [vmem:[#allocation12 + $0x28] sm:$0xff] }
  0x66   :  { %1449 = vmatpush3.msra.mxu1 %v183_v12  ;;  %1414 = vmatpush3.msra.mxu0 %v183_v12  ;;  %v443_v12 = vld [vmem:[#allocation7 + $0x10] sm:$0xff] }
  0x67   :  { %1450 = vmatprep.subr.mxu1 %v1714_v0  ;;  %1415 = vmatprep.subr.mxu0 %v1714_v0 }
  0x68   :  { %1451 = vmatpush3.msra.mxu1 %v182_v13  ;;  %1416 = vmatpush3.msra.mxu0 %v182_v13  ;;  %v341_v13 = vld [vmem:[#allocation12 + $0x20] sm:$0xff] }
  0x69   :  { %1452 = vmatprep.subr.mxu1 %v1714_v0  ;;  %1417 = vmatprep.subr.mxu0 %v1714_v0 }
  0x6a   :  { %1453 = vmatpush3.msra.mxu1 %v181_v14  ;;  %1418 = vmatpush3.msra.mxu0 %v181_v14  ;;  %v442_v14 = vld [vmem:[#allocation7 + $0x8] sm:$0xff] }
  0x6b   :  { %1454 = vmatprep.subr.mxu1 %v1714_v0  ;;  %1419 = vmatprep.subr.mxu0 %v1714_v0 }
  0x6c   :  { %1455 = vmatpush3.msra.mxu1 %v180_v15  ;;  %1420 = vmatpush3.msra.mxu0 %v180_v15  ;;  %v340_v15 = vld [vmem:[#allocation12 + $0x18] sm:$0xff] }
  0x6d   :  { %1456 = vmatprep.subr.mxu1 %v1714_v0  ;;  %1421 = vmatprep.subr.mxu0 %v1714_v0 }
  0x6e   :  { %1457 = vmatpush3.msra.mxu1 %v179_v16  ;;  %1422 = vmatpush3.msra.mxu0 %v179_v16  ;;  %v441_v16 = vld [vmem:[#allocation7] sm:$0xff] }
  0x6f   :  { %1459 = vmatmul.mubr.f32.vlgmr.msra.gmra.mxu1 %v265_v17  ;;  %516 = vmatprep.subr.mxu1 %v472_v18  ;;  %v339_v17 = vld [vmem:[#allocation12 + $0x10] sm:$0xff]  ;;  %v1847_v18 = vld.sshfl [vmem:[%s1939_s3] sm:$0x33 pattern:$0x76325410] }
  0x70   :  { %517 = vmatpush1.msra.mxu1 %v471_v19  ;;  %369 = vmatprep.subr.mxu0 %v368_v20  ;;  %v504_v19 = vld [vmem:[#allocation7 + $0x1f8] sm:$0xff]  ;;  %v338_v20 = vld [vmem:[#allocation12 + $0x8] sm:$0xff] }
  0x71   :  { %518 = vmatprep.subr.mxu1 %v470_v21  ;;  %1424 = vmatmul.mubr.f32.vlgmr.msra.gmra.mxu0 %v178_v22  ;;  %v503_v21 = vld [vmem:[#allocation7 + $0x1f0] sm:$0xff]  ;;  %v337_v22 = vld [vmem:[#allocation12] sm:$0xff] }
  0x72   :  { %519 = vmatpush1.msra.mxu1 %v469_v23  ;;  %370 = vmatpush1.msra.mxu0 %v367_v24  ;;  %v502_v23 = vld [vmem:[#allocation7 + $0x1e8] sm:$0xff]  ;;  %v513_v24 = vcombine.high %v1847_v18, %v1847_v18 }
  0x73   :  { %520 = vmatprep.subr.mxu1 %v468_v25  ;;  %371 = vmatprep.subr.mxu0 %v366_v26  ;;  %v501_v25 = vld [vmem:[#allocation7 + $0x1e0] sm:$0xff]  ;;  %v500_v26 = vld [vmem:[#allocation7 + $0x1d8] sm:$0xff] }
  0x74   :  { %521 = vmatpush1.msra.mxu1 %v467_v27  ;;  %372 = vmatpush1.msra.mxu0 %v365_v28  ;;  %v336_v27 = vld [vmem:[%s1940_s4] sm:$0x3]  ;;  %v499_v28 = vld [vmem:[#allocation7 + $0x1d0] sm:$0xff]  ;;  %s103_s4 = sld [smem:[#allocation5]] }
  0x75   :  { %522 = vmatprep.subr.mxu1 %v466_v29  ;;  %373 = vmatprep.subr.mxu0 %v364_v30  ;;  %v498_v29 = vld [vmem:[#allocation7 + $0x1c8] sm:$0xff]  ;;  %v497_v30 = vld [vmem:[#allocation7 + $0x1c0] sm:$0xff] }
  0x76   :  { %523 = vmatpush1.msra.mxu1 %v465_v31  ;;  %374 = vmatpush1.msra.mxu0 %v363_v32  ;;  %v496_v31 = vld [vmem:[#allocation7 + $0x1b8] sm:$0xff]  ;;  %v495_v32 = vld [vmem:[#allocation7 + $0x1b0] sm:$0xff] }
  0x77   :  { %524 = vmatprep.subr.mxu1 %v464_v33  ;;  %375 = vmatprep.subr.mxu0 %v362_v34  ;;  %v494_v33 = vld [vmem:[#allocation7 + $0x1a8] sm:$0xff]  ;;  %v493_v34 = vld [vmem:[#allocation7 + $0x1a0] sm:$0xff] }
  0x78   :  { %525 = vmatpush1.msra.mxu1 %v463_v35  ;;  %376 = vmatpush1.msra.mxu0 %v361_v36  ;;  %v492_v35 = vld [vmem:[#allocation7 + $0x198] sm:$0xff]  ;;  %v491_v36 = vld [vmem:[#allocation7 + $0x190] sm:$0xff] }
  0x79   :  { %526 = vmatprep.subr.mxu1 %v462_v37  ;;  %377 = vmatprep.subr.mxu0 %v360_v38  ;;  %v490_v37 = vld [vmem:[#allocation7 + $0x188] sm:$0xff]  ;;  %v489_v38 = vld [vmem:[#allocation7 + $0x180] sm:$0xff] }
  0x7a   :  { %527 = vmatpush1.msra.mxu1 %v461_v39  ;;  %378 = vmatpush1.msra.mxu0 %v359_v40  ;;  %v488_v39 = vld [vmem:[#allocation7 + $0x178] sm:$0xff]  ;;  %v487_v40 = vld [vmem:[#allocation7 + $0x170] sm:$0xff]  ;;  %p104_p2 = scmp.lt.s32.totalorder %s103_s4, 7 }
  0x7b   :  { %528 = vmatprep.subr.mxu1 %v460_v41  ;;  %379 = vmatprep.subr.mxu0 %v358_v42  ;;  %v486_v41 = vld [vmem:[#allocation7 + $0x168] sm:$0xff]  ;;  %v485_v42 = vld [vmem:[#allocation7 + $0x160] sm:$0xff] }
  0x7c   :  { %529 = vmatpush1.msra.mxu1 %v459_v43  ;;  %380 = vmatpush1.msra.mxu0 %v357_v44  ;;  %v484_v43 = vld [vmem:[#allocation7 + $0x158] sm:$0xff]  ;;  %v483_v44 = vld [vmem:[#allocation7 + $0x150] sm:$0xff]  ;;  %s1951_s4 = smov (!%p104_p2, %s103_s4), 7 }
  0x7d   :  { %530 = vmatprep.subr.mxu1 %v458_v45  ;;  %381 = vmatprep.subr.mxu0 %v356_v46  ;;  %v482_v45 = vld [vmem:[#allocation7 + $0x148] sm:$0xff]  ;;  %v481_v46 = vld [vmem:[#allocation7 + $0x140] sm:$0xff]  ;;  %s1348_s18 = sshll.u32 %s1951_s4, 4 }
  0x7e   :  { %531 = vmatpush1.msra.mxu1 %v457_v47  ;;  %382 = vmatpush1.msra.mxu0 %v355_v48  ;;  %v480_v47 = vld [vmem:[#allocation7 + $0x138] sm:$0xff]  ;;  %v479_v48 = vld [vmem:[#allocation7 + $0x130] sm:$0xff]  ;;  %s112_s21 = scalar_lea.hbm %s1938_s2, %s1348_s18 }
  0x7f   :  { %532 = vmatprep.subr.mxu1 %v456_v49  ;;  %383 = vmatprep.subr.mxu0 %v354_v50  ;;  %v478_v49 = vld [vmem:[#allocation7 + $0x128] sm:$0xff]  ;;  %v477_v50 = vld [vmem:[#allocation7 + $0x120] sm:$0xff]  ;;  %s1582_s22 = scalar_lea.hbm %s112_s21, 16  ;;  %p1585_p4 = scmp.lt.s32.totalorder %s112_s21, %s1938_s2 }
  0x80   :  { %533 = vmatpush1.msra.mxu1 %v455_v51  ;;  %384 = vmatpush1.msra.mxu0 %v353_v52  ;;  %v476_v51 = vld [vmem:[#allocation7 + $0x118] sm:$0xff]  ;;  %v475_v52 = vld [vmem:[#allocation7 + $0x110] sm:$0xff]  ;;  %p1583_p3 = scmp.ne.s32.totalorder %s112_s21, %s1582_s22  ;;  %p1586_p5 = scmp.lt.s32.totalorder %s1872_s25, %s1582_s22 }
  0x81   :  { %534 = vmatprep.subr.mxu1 %v454_v53  ;;  %385 = vmatprep.subr.mxu0 %v352_v54  ;;  %v474_v53 = vld [vmem:[#allocation7 + $0x108] sm:$0xff]  ;;  %v473_v54 = vld [vmem:[#allocation7 + $0x100] sm:$0xff] }
  0x82   :  { %535 = vmatpush1.msra.mxu1 %v453_v55  ;;  %386 = vmatpush1.msra.mxu0 %v351_v56  ;;  %v682_v55 = vld [vmem:[#allocation13 + $0x4f8] sm:$0xff]  ;;  %v681_v56 = vld [vmem:[#allocation13 + $0x4f0] sm:$0xff]  ;;  %p1587_p6 = por %p1586_p5, %p1585_p4 }
  0x83   :  { %536 = vmatprep.subr.mxu1 %v452_v57  ;;  %387 = vmatprep.subr.mxu0 %v350_v58  ;;  %v618_v57 = vld [vmem:[#allocation13 + $0x2f8] sm:$0xff]  ;;  %v680_v58 = vld [vmem:[#allocation13 + $0x4e8] sm:$0xff] }
  0x84   :  { %537 = vmatpush1.msra.mxu1 %v451_v59  ;;  %388 = vmatpush1.msra.mxu0 %v349_v60  ;;  %v617_v59 = vld [vmem:[#allocation13 + $0x2f0] sm:$0xff]  ;;  %v679_v60 = vld [vmem:[#allocation13 + $0x4e0] sm:$0xff]  ;;  %p1588_p7 = pnand %p1587_p6, %p1583_p3 }
  0x85   :  { %538 = vmatprep.subr.mxu1 %v450_v61  ;;  %389 = vmatprep.subr.mxu0 %v348_v62  ;;  %v616_v61 = vld [vmem:[#allocation13 + $0x2e8] sm:$0xff]  ;;  %v678_v62 = vld [vmem:[#allocation13 + $0x4d8] sm:$0xff] }
  0x86   :  { %539 = vmatpush1.msra.mxu1 %v449_v63  ;;  %390 = vmatpush1.msra.mxu0 %v347_v1  ;;  %v615_v63 = vld [vmem:[#allocation13 + $0x2e0] sm:$0xff]  ;;  %v677_v1 = vld [vmem:[#allocation13 + $0x4d0] sm:$0xff] }
  0x87   :  { %540 = vmatprep.subr.mxu1 %v448_v2  ;;  %391 = vmatprep.subr.mxu0 %v346_v3  ;;  %v614_v2 = vld [vmem:[#allocation13 + $0x2d8] sm:$0xff]  ;;  %v676_v3 = vld [vmem:[#allocation13 + $0x4c8] sm:$0xff] }
  0x88   :  { %541 = vmatpush1.msra.mxu1 %v447_v4  ;;  %392 = vmatpush1.msra.mxu0 %v345_v5  ;;  %v613_v4 = vld [vmem:[#allocation13 + $0x2d0] sm:$0xff]  ;;  %v612_v5 = vld [vmem:[#allocation13 + $0x2c8] sm:$0xff] }
  0x89   :  { %542 = vmatprep.subr.mxu1 %v446_v6  ;;  %393 = vmatprep.subr.mxu0 %v344_v7  ;;  %v675_v6 = vld [vmem:[#allocation13 + $0x4c0] sm:$0xff] }
  0x8a   :  { %543 = vmatpush1.msra.mxu1 %v445_v8  ;;  %394 = vmatpush1.msra.mxu0 %v343_v9  ;;  %v611_v7 = vld [vmem:[#allocation13 + $0x2c0] sm:$0xff]  ;;  %v674_v8 = vld [vmem:[#allocation13 + $0x4b8] sm:$0xff] }
  0x8b   :  { %544 = vmatprep.subr.mxu1 %v444_v10  ;;  %395 = vmatprep.subr.mxu0 %v342_v11  ;;  %v610_v9 = vld [vmem:[#allocation13 + $0x2b8] sm:$0xff]  ;;  %v673_v10 = vld [vmem:[#allocation13 + $0x4b0] sm:$0xff] }
  0x8c   :  { %545 = vmatpush1.msra.mxu1 %v443_v12  ;;  %396 = vmatpush1.msra.mxu0 %v341_v13  ;;  %v609_v11 = vld [vmem:[#allocation13 + $0x2b0] sm:$0xff]  ;;  %v672_v12 = vld [vmem:[#allocation13 + $0x4a8] sm:$0xff] }
  0x8d   :  { %546 = vmatprep.subr.mxu1 %v442_v14  ;;  %397 = vmatprep.subr.mxu0 %v340_v15  ;;  %v608_v13 = vld [vmem:[#allocation13 + $0x2a8] sm:$0xff]  ;;  %v671_v14 = vld [vmem:[#allocation13 + $0x4a0] sm:$0xff] }
  0x8e   :  { %547 = vmatpush1.msra.mxu1 %v441_v16  ;;  %398 = vmatpush1.msra.mxu0 %v339_v17  ;;  %v607_v15 = vld [vmem:[#allocation13 + $0x2a0] sm:$0xff]  ;;  %v670_v16 = vld [vmem:[#allocation13 + $0x498] sm:$0xff] }
  0x8f   :  { %548 = vmatprep.subr.mxu1 %v504_v19  ;;  %399 = vmatprep.subr.mxu0 %v338_v20  ;;  %v606_v17 = vld [vmem:[#allocation13 + $0x298] sm:$0xff]  ;;  %v605_v19 = vld [vmem:[#allocation13 + $0x290] sm:$0xff]  ;;  %v668_v20 = vld [vmem:[#allocation13 + $0x488] sm:$0xff] }
  0x90   :  { %549 = vmatpush2.msra.mxu1 %v503_v21  ;;  %400 = vmatpush1.msra.mxu0 %v337_v22  ;;  %v604_v21 = vld [vmem:[#allocation13 + $0x288] sm:$0xff]  ;;  %v667_v22 = vld [vmem:[#allocation13 + $0x480] sm:$0xff] }
  0x91   :  { %550 = vmatprep.subr.mxu1 %v502_v23  ;;  %433 = vmatprep.mubr.f32.mxu0 %v1714_v0  ;;  %v603_v23 = vld [vmem:[#allocation13 + $0x280] sm:$0xff] }
  0x92   :  { %551 = vmatpush2.msra.mxu1 %v501_v25  ;;  %580 = vmatprep.mubr.f32.mxu1 %v513_v24  ;;  %v666_v24 = vld [vmem:[#allocation13 + $0x478] sm:$0xff] }
  0x93   :  { %552 = vmatprep.subr.mxu1 %v500_v26  ;;  %434 = vmatmul.mubr.f32.vlgmr.msra.gmra.mxu0 %v336_v27  ;;  %v602_v25 = vld [vmem:[#allocation13 + $0x278] sm:$0xff]  ;;  %v665_v26 = vld [vmem:[#allocation13 + $0x470] sm:$0xff] }
  0x94   :  { %553 = vmatpush2.msra.mxu1 %v499_v28  ;;  %715 = vmatprep.subr.mxu0 %v682_v55  ;;  %v601_v27 = vld [vmem:[#allocation13 + $0x270] sm:$0xff]  ;;  %v664_v28 = vld [vmem:[#allocation13 + $0x468] sm:$0xff]  ;;  %v587_v55 = vld [vmem:[#allocation13 + $0x200] sm:$0xff] }
  0x95   :  { %554 = vmatprep.subr.mxu1 %v498_v29  ;;  %716 = vmatpush1.msra.mxu0 %v681_v56  ;;  %v600_v29 = vld [vmem:[#allocation13 + $0x268] sm:$0xff]  ;;  %v714_v56 = vld [vmem:[#allocation13 + $0x5f8] sm:$0xff] }
  0x96   :  { %555 = vmatpush2.msra.mxu1 %v497_v30  ;;  %717 = vmatprep.subr.mxu0 %v680_v58  ;;  %v663_v30 = vld [vmem:[#allocation13 + $0x460] sm:$0xff]  ;;  %v713_v58 = vld [vmem:[#allocation13 + $0x5f0] sm:$0xff] }
  0x97   :  { %556 = vmatprep.subr.mxu1 %v496_v31  ;;  %718 = vmatpush1.msra.mxu0 %v679_v60  ;;  %v599_v31 = vld [vmem:[#allocation13 + $0x260] sm:$0xff]  ;;  %v712_v60 = vld [vmem:[#allocation13 + $0x5e8] sm:$0xff] }
  0x98   :  { %557 = vmatpush2.msra.mxu1 %v495_v32  ;;  %719 = vmatprep.subr.mxu0 %v678_v62  ;;  %v662_v32 = vld [vmem:[#allocation13 + $0x458] sm:$0xff]  ;;  %v711_v62 = vld [vmem:[#allocation13 + $0x5e0] sm:$0xff] }
  0x99   :  { %558 = vmatprep.subr.mxu1 %v494_v33  ;;  %720 = vmatpush1.msra.mxu0 %v677_v1  ;;  %v598_v33 = vld [vmem:[#allocation13 + $0x258] sm:$0xff] }
  0x9a   :  { %559 = vmatpush2.msra.mxu1 %v493_v34  ;;  %721 = vmatprep.subr.mxu0 %v676_v3  ;;  %v661_v34 = vld [vmem:[#allocation13 + $0x450] sm:$0xff]  ;;  %v710_v1 = vld [vmem:[#allocation13 + $0x5d8] sm:$0xff] }
  0x9b   :  { %560 = vmatprep.subr.mxu1 %v492_v35  ;;  %722 = vmatpush1.msra.mxu0 %v675_v6  ;;  %v597_v35 = vld [vmem:[#allocation13 + $0x250] sm:$0xff]  ;;  %v644_v6 = vld [vmem:[#allocation13 + $0x3c8] sm:$0xff] }
  0x9c   :  { %561 = vmatpush2.msra.mxu1 %v491_v36  ;;  %723 = vmatprep.subr.mxu0 %v674_v8  ;;  %v660_v36 = vld [vmem:[#allocation13 + $0x448] sm:$0xff]  ;;  %v709_v3 = vld [vmem:[#allocation13 + $0x5d0] sm:$0xff]  ;;  %v643_v8 = vld [vmem:[#allocation13 + $0x3c0] sm:$0xff] }
  0x9d   :  { %562 = vmatprep.subr.mxu1 %v490_v37  ;;  %724 = vmatpush1.msra.mxu0 %v673_v10  ;;  %v596_v37 = vld [vmem:[#allocation13 + $0x248] sm:$0xff]  ;;  %v642_v10 = vld [vmem:[#allocation13 + $0x3b8] sm:$0xff] }
  0x9e   :  { %563 = vmatpush2.msra.mxu1 %v489_v38  ;;  %725 = vmatprep.subr.mxu0 %v672_v12  ;;  %v659_v38 = vld [vmem:[#allocation13 + $0x440] sm:$0xff]  ;;  %v641_v12 = vld [vmem:[#allocation13 + $0x3b0] sm:$0xff] }
  0x9f   :  { %564 = vmatprep.subr.mxu1 %v488_v39  ;;  %726 = vmatpush1.msra.mxu0 %v671_v14  ;;  %v595_v39 = vld [vmem:[#allocation13 + $0x240] sm:$0xff]  ;;  %v640_v14 = vld [vmem:[#allocation13 + $0x3a8] sm:$0xff] }
  0xa0   :  { %565 = vmatpush2.msra.mxu1 %v487_v40  ;;  %727 = vmatprep.subr.mxu0 %v670_v16  ;;  %v658_v40 = vld [vmem:[#allocation13 + $0x438] sm:$0xff]  ;;  %v639_v16 = vld [vmem:[#allocation13 + $0x3a0] sm:$0xff] }
  0xa1   :  { %566 = vmatprep.subr.mxu1 %v486_v41  ;;  %v594_v41 = vld [vmem:[#allocation13 + $0x238] sm:$0xff] }
  0xa2   :  { %567 = vmatpush2.msra.mxu1 %v485_v42  ;;  %v657_v42 = vld [vmem:[#allocation13 + $0x430] sm:$0xff] }
  0xa3   :  { %568 = vmatprep.subr.mxu1 %v484_v43  ;;  %v593_v43 = vld [vmem:[#allocation13 + $0x230] sm:$0xff] }
  0xa4   :  { %569 = vmatpush2.msra.mxu1 %v483_v44  ;;  %v656_v44 = vld [vmem:[#allocation13 + $0x428] sm:$0xff] }
  0xa5   :  { %570 = vmatprep.subr.mxu1 %v482_v45  ;;  %v592_v45 = vld [vmem:[#allocation13 + $0x228] sm:$0xff] }
  0xa6   :  { %571 = vmatpush2.msra.mxu1 %v481_v46  ;;  %v655_v46 = vld [vmem:[#allocation13 + $0x420] sm:$0xff] }
  0xa7   :  { %572 = vmatprep.subr.mxu1 %v480_v47  ;;  %v591_v47 = vld [vmem:[#allocation13 + $0x220] sm:$0xff] }
  0xa8   :  { %573 = vmatpush2.msra.mxu1 %v479_v48  ;;  %v654_v48 = vld [vmem:[#allocation13 + $0x418] sm:$0xff] }
  0xa9   :  { %574 = vmatprep.subr.mxu1 %v478_v49  ;;  %v590_v49 = vld [vmem:[#allocation13 + $0x218] sm:$0xff] }
  0xaa   :  { %575 = vmatpush2.msra.mxu1 %v477_v50  ;;  %v653_v50 = vld [vmem:[#allocation13 + $0x410] sm:$0xff] }
  0xab   :  { %576 = vmatprep.subr.mxu1 %v476_v51  ;;  %v589_v51 = vld [vmem:[#allocation13 + $0x210] sm:$0xff] }
  0xac   :  { %577 = vmatpush2.msra.mxu1 %v475_v52  ;;  %v652_v52 = vld [vmem:[#allocation13 + $0x408] sm:$0xff] }
  0xad   :  { %578 = vmatprep.subr.mxu1 %v474_v53  ;;  %v588_v53 = vld [vmem:[#allocation13 + $0x208] sm:$0xff] }
  0xae   :  { %579 = vmatpush2.msra.mxu1 %v473_v54  ;;  %v651_v54 = vld [vmem:[#allocation13 + $0x400] sm:$0xff] }
  0xaf   :  { %581 = vmatmul.mubr.f32.vlgmr.msra.gmra.mxu1 %v1847_v18  ;;  %786 = vmatprep.subr.mxu1 %v618_v57  ;;  %v669_v18 = vld [vmem:[#allocation13 + $0x490] sm:$0xff]  ;;  %v650_v57 = vld [vmem:[#allocation13 + $0x3f8] sm:$0xff] }
  0xb0   :  { %787 = vmatpush1.msra.mxu1 %v617_v59  ;;  %728 = vmatpush1.msra.mxu0 %v669_v18  ;;  %v649_v59 = vld [vmem:[#allocation13 + $0x3f0] sm:$0xff]  ;;  %v638_v18 = vld [vmem:[#allocation13 + $0x398] sm:$0xff] }
  0xb1   :  { %788 = vmatprep.subr.mxu1 %v616_v61  ;;  %729 = vmatprep.subr.mxu0 %v668_v20  ;;  %v648_v61 = vld [vmem:[#allocation13 + $0x3e8] sm:$0xff]  ;;  %v637_v20 = vld [vmem:[#allocation13 + $0x390] sm:$0xff] }
  0xb2   :  { %789 = vmatpush1.msra.mxu1 %v615_v63  ;;  %730 = vmatpush1.msra.mxu0 %v667_v22  ;;  %v647_v63 = vld [vmem:[#allocation13 + $0x3e0] sm:$0xff]  ;;  %v636_v22 = vld [vmem:[#allocation13 + $0x388] sm:$0xff] }
  0xb3   :  { %790 = vmatprep.subr.mxu1 %v614_v2  ;;  %731 = vmatprep.subr.mxu0 %v666_v24  ;;  %v646_v2 = vld [vmem:[#allocation13 + $0x3d8] sm:$0xff]  ;;  %v635_v24 = vld [vmem:[#allocation13 + $0x380] sm:$0xff] }
  0xb4   :  { %791 = vmatpush1.msra.mxu1 %v613_v4  ;;  %732 = vmatpush1.msra.mxu0 %v665_v26  ;;  %v645_v4 = vld [vmem:[#allocation13 + $0x3d0] sm:$0xff]  ;;  %v634_v26 = vld [vmem:[#allocation13 + $0x378] sm:$0xff] }
  0xb5   :  { %792 = vmatprep.subr.mxu1 %v612_v5  ;;  %733 = vmatprep.subr.mxu0 %v664_v28  ;;  %v708_v5 = vld [vmem:[#allocation13 + $0x5c8] sm:$0xff]  ;;  %v633_v28 = vld [vmem:[#allocation13 + $0x370] sm:$0xff] }
  0xb6   :  { %793 = vmatpush1.msra.mxu1 %v611_v7  ;;  %734 = vmatpush1.msra.mxu0 %v663_v30  ;;  %v707_v7 = vld [vmem:[#allocation13 + $0x5c0] sm:$0xff]  ;;  %v632_v30 = vld [vmem:[#allocation13 + $0x368] sm:$0xff] }
  0xb7   :  { %794 = vmatprep.subr.mxu1 %v610_v9  ;;  %735 = vmatprep.subr.mxu0 %v662_v32  ;;  %v706_v9 = vld [vmem:[#allocation13 + $0x5b8] sm:$0xff]  ;;  %v631_v32 = vld [vmem:[#allocation13 + $0x360] sm:$0xff] }
  0xb8   :  { %795 = vmatpush1.msra.mxu1 %v609_v11  ;;  %736 = vmatpush1.msra.mxu0 %v661_v34  ;;  %v705_v11 = vld [vmem:[#allocation13 + $0x5b0] sm:$0xff]  ;;  %v630_v34 = vld [vmem:[#allocation13 + $0x358] sm:$0xff] }
  0xb9   :  { %796 = vmatprep.subr.mxu1 %v608_v13  ;;  %737 = vmatprep.subr.mxu0 %v660_v36  ;;  %v704_v13 = vld [vmem:[#allocation13 + $0x5a8] sm:$0xff]  ;;  %v629_v36 = vld [vmem:[#allocation13 + $0x350] sm:$0xff] }
  0xba   :  { %797 = vmatpush1.msra.mxu1 %v607_v15  ;;  %738 = vmatpush1.msra.mxu0 %v659_v38  ;;  %v703_v15 = vld [vmem:[#allocation13 + $0x5a0] sm:$0xff]  ;;  %v628_v38 = vld [vmem:[#allocation13 + $0x348] sm:$0xff] }
  0xbb   :  { %798 = vmatprep.subr.mxu1 %v606_v17  ;;  %739 = vmatprep.subr.mxu0 %v658_v40  ;;  %v702_v17 = vld [vmem:[#allocation13 + $0x598] sm:$0xff]  ;;  %v627_v40 = vld [vmem:[#allocation13 + $0x340] sm:$0xff] }
  0xbc   :  { %799 = vmatpush1.msra.mxu1 %v605_v19  ;;  %740 = vmatpush1.msra.mxu0 %v657_v42  ;;  %v701_v19 = vld [vmem:[#allocation13 + $0x590] sm:$0xff]  ;;  %v626_v42 = vld [vmem:[#allocation13 + $0x338] sm:$0xff] }
  0xbd   :  { %800 = vmatprep.subr.mxu1 %v604_v21  ;;  %741 = vmatprep.subr.mxu0 %v656_v44  ;;  %v700_v21 = vld [vmem:[#allocation13 + $0x588] sm:$0xff]  ;;  %v625_v44 = vld [vmem:[#allocation13 + $0x330] sm:$0xff] }
  0xbe   :  { %801 = vmatpush1.msra.mxu1 %v603_v23  ;;  %742 = vmatpush1.msra.mxu0 %v655_v46  ;;  %v699_v23 = vld [vmem:[#allocation13 + $0x580] sm:$0xff]  ;;  %v624_v46 = vld [vmem:[#allocation13 + $0x328] sm:$0xff] }
  0xbf   :  { %802 = vmatprep.subr.mxu1 %v602_v25  ;;  %743 = vmatprep.subr.mxu0 %v654_v48  ;;  %v698_v25 = vld [vmem:[#allocation13 + $0x578] sm:$0xff]  ;;  %v623_v48 = vld [vmem:[#allocation13 + $0x320] sm:$0xff] }
  0xc0   :  { %803 = vmatpush1.msra.mxu1 %v601_v27  ;;  %744 = vmatpush1.msra.mxu0 %v653_v50  ;;  %v697_v27 = vld [vmem:[#allocation13 + $0x570] sm:$0xff] }
  0xc1   :  { %804 = vmatprep.subr.mxu1 %v600_v29  ;;  %745 = vmatprep.subr.mxu0 %v652_v52  ;;  %v696_v29 = vld [vmem:[#allocation13 + $0x568] sm:$0xff]  ;;  %v685_v50 = vld [vmem:[#allocation13 + $0x510] sm:$0xff] }
  0xc2   :  { %805 = vmatpush1.msra.mxu1 %v599_v31  ;;  %746 = vmatpush1.msra.mxu0 %v651_v54  ;;  %v695_v31 = vld [vmem:[#allocation13 + $0x560] sm:$0xff]  ;;  %v684_v52 = vld [vmem:[#allocation13 + $0x508] sm:$0xff] }
  0xc3   :  { %806 = vmatprep.subr.mxu1 %v598_v33  ;;  %747 = vmatprep.subr.mxu0 %v714_v56  ;;  %v694_v33 = vld [vmem:[#allocation13 + $0x558] sm:$0xff]  ;;  %v683_v54 = vld [vmem:[#allocation13 + $0x500] sm:$0xff] }
  0xc4   :  { %807 = vmatpush1.msra.mxu1 %v597_v35  ;;  %748 = vmatpush2.msra.mxu0 %v713_v58  ;;  %v693_v35 = vld [vmem:[#allocation13 + $0x550] sm:$0xff]  ;;  %v619_v56 = vld [vmem:[#allocation13 + $0x300] sm:$0xff] }
  0xc5   :  { %808 = vmatprep.subr.mxu1 %v596_v37  ;;  %749 = vmatprep.subr.mxu0 %v712_v60  ;;  %v692_v37 = vld [vmem:[#allocation13 + $0x548] sm:$0xff] }
  0xc6   :  { %809 = vmatpush1.msra.mxu1 %v595_v39  ;;  %750 = vmatpush2.msra.mxu0 %v711_v62  ;;  %v691_v39 = vld [vmem:[#allocation13 + $0x540] sm:$0xff] }
  0xc7   :  { %810 = vmatprep.subr.mxu1 %v594_v41  ;;  %751 = vmatprep.subr.mxu0 %v710_v1  ;;  %v690_v41 = vld [vmem:[#allocation13 + $0x538] sm:$0xff] }
  0xc8   :  { %811 = vmatpush1.msra.mxu1 %v593_v43  ;;  %752 = vmatpush2.msra.mxu0 %v709_v3  ;;  %v689_v43 = vld [vmem:[#allocation13 + $0x530] sm:$0xff] }
  0xc9   :  { %812 = vmatprep.subr.mxu1 %v592_v45  ;;  %753 = vmatprep.subr.mxu0 %v708_v5  ;;  %v688_v45 = vld [vmem:[#allocation13 + $0x528] sm:$0xff]  ;;  %v887_v3 = vld [vmem:[#allocation13 + $0x6f0] sm:$0xff]  ;;  %v885_v5 = vld [vmem:[#allocation13 + $0x6e0] sm:$0xff] }
  0xca   :  { %813 = vmatpush1.msra.mxu1 %v591_v47  ;;  %754 = vmatpush2.msra.mxu0 %v707_v7  ;;  %v687_v47 = vld [vmem:[#allocation13 + $0x520] sm:$0xff]  ;;  %v883_v7 = vld [vmem:[#allocation13 + $0x6d0] sm:$0xff] }
  0xcb   :  { %814 = vmatprep.subr.mxu1 %v590_v49  ;;  %755 = vmatprep.subr.mxu0 %v706_v9  ;;  %v686_v49 = vld [vmem:[#allocation13 + $0x518] sm:$0xff]  ;;  %v881_v9 = vld [vmem:[#allocation13 + $0x6c0] sm:$0xff] }
  0xcc   :  { %815 = vmatpush1.msra.mxu1 %v589_v51  ;;  %756 = vmatpush2.msra.mxu0 %v705_v11  ;;  %v622_v51 = vld [vmem:[#allocation13 + $0x318] sm:$0xff]  ;;  %v879_v11 = vld [vmem:[#allocation13 + $0x6b0] sm:$0xff] }
  0xcd   :  { %816 = vmatprep.subr.mxu1 %v588_v53  ;;  %757 = vmatprep.subr.mxu0 %v704_v13  ;;  %v621_v53 = vld [vmem:[#allocation13 + $0x310] sm:$0xff]  ;;  %v877_v13 = vld [vmem:[#allocation13 + $0x6a0] sm:$0xff] }
  0xce   :  { %817 = vmatpush1.msra.mxu1 %v587_v55  ;;  %758 = vmatpush2.msra.mxu0 %v703_v15  ;;  %v620_v55 = vld [vmem:[#allocation13 + $0x308] sm:$0xff]  ;;  %v875_v15 = vld [vmem:[#allocation13 + $0x690] sm:$0xff] }
  0xcf   :  { %818 = vmatprep.subr.mxu1 %v650_v57  ;;  %759 = vmatprep.subr.mxu0 %v702_v17  ;;  %v888_v57 = vld [vmem:[#allocation13 + $0x6f8] sm:$0xff]  ;;  %v873_v17 = vld [vmem:[#allocation13 + $0x680] sm:$0xff] }
  0xd0   :  { %819 = vmatpush2.msra.mxu1 %v649_v59  ;;  %760 = vmatpush2.msra.mxu0 %v701_v19  ;;  %v871_v19 = vld [vmem:[#allocation13 + $0x670] sm:$0xff] }
  0xd1   :  { %820 = vmatprep.subr.mxu1 %v648_v61  ;;  %761 = vmatprep.subr.mxu0 %v700_v21  ;;  %v869_v21 = vld [vmem:[#allocation13 + $0x660] sm:$0xff] }
  0xd2   :  { %821 = vmatpush2.msra.mxu1 %v647_v63  ;;  %762 = vmatpush2.msra.mxu0 %v699_v23  ;;  %v867_v23 = vld [vmem:[#allocation13 + $0x650] sm:$0xff] }
  0xd3   :  { %822 = vmatprep.subr.mxu1 %v646_v2  ;;  %763 = vmatprep.subr.mxu0 %v698_v25  ;;  %v865_v25 = vld [vmem:[#allocation13 + $0x640] sm:$0xff] }
  0xd4   :  { %823 = vmatpush2.msra.mxu1 %v645_v4  ;;  %764 = vmatpush2.msra.mxu0 %v697_v27  ;;  %v886_v4 = vld [vmem:[#allocation13 + $0x6e8] sm:$0xff]  ;;  %v863_v27 = vld [vmem:[#allocation13 + $0x630] sm:$0xff] }
  0xd5   :  { %824 = vmatprep.subr.mxu1 %v644_v6  ;;  %765 = vmatprep.subr.mxu0 %v696_v29  ;;  %v884_v6 = vld [vmem:[#allocation13 + $0x6d8] sm:$0xff]  ;;  %v861_v29 = vld [vmem:[#allocation13 + $0x620] sm:$0xff] }
  0xd6   :  { %825 = vmatpush2.msra.mxu1 %v643_v8  ;;  %766 = vmatpush2.msra.mxu0 %v695_v31  ;;  %v882_v8 = vld [vmem:[#allocation13 + $0x6c8] sm:$0xff]  ;;  %v859_v31 = vld [vmem:[#allocation13 + $0x610] sm:$0xff] }
  0xd7   :  { %826 = vmatprep.subr.mxu1 %v642_v10  ;;  %767 = vmatprep.subr.mxu0 %v694_v33  ;;  %v880_v10 = vld [vmem:[#allocation13 + $0x6b8] sm:$0xff]  ;;  %v857_v33 = vld [vmem:[#allocation13 + $0x600] sm:$0xff] }
  0xd8   :  { %827 = vmatpush2.msra.mxu1 %v641_v12  ;;  %768 = vmatpush2.msra.mxu0 %v693_v35  ;;  %v878_v12 = vld [vmem:[#allocation13 + $0x6a8] sm:$0xff]  ;;  %v992_v35 = vld [vmem:[#allocation13 + $0x7f0] sm:$0xff] }
  0xd9   :  { %828 = vmatprep.subr.mxu1 %v640_v14  ;;  %769 = vmatprep.subr.mxu0 %v692_v37  ;;  %v876_v14 = vld [vmem:[#allocation13 + $0x698] sm:$0xff]  ;;  %v990_v37 = vld [vmem:[#allocation13 + $0x7e0] sm:$0xff] }
  0xda   :  { %829 = vmatpush2.msra.mxu1 %v639_v16  ;;  %770 = vmatpush2.msra.mxu0 %v691_v39  ;;  %v874_v16 = vld [vmem:[#allocation13 + $0x688] sm:$0xff]  ;;  %v988_v39 = vld [vmem:[#allocation13 + $0x7d0] sm:$0xff] }
  0xdb   :  { %830 = vmatprep.subr.mxu1 %v638_v18  ;;  %771 = vmatprep.subr.mxu0 %v690_v41  ;;  %v872_v18 = vld [vmem:[#allocation13 + $0x678] sm:$0xff]  ;;  %v986_v41 = vld [vmem:[#allocation13 + $0x7c0] sm:$0xff] }
  0xdc   :  { %831 = vmatpush2.msra.mxu1 %v637_v20  ;;  %772 = vmatpush2.msra.mxu0 %v689_v43  ;;  %v870_v20 = vld [vmem:[#allocation13 + $0x668] sm:$0xff]  ;;  %v984_v43 = vld [vmem:[#allocation13 + $0x7b0] sm:$0xff] }
  0xdd   :  { %832 = vmatprep.subr.mxu1 %v636_v22  ;;  %773 = vmatprep.subr.mxu0 %v688_v45  ;;  %v868_v22 = vld [vmem:[#allocation13 + $0x658] sm:$0xff]  ;;  %v982_v45 = vld [vmem:[#allocation13 + $0x7a0] sm:$0xff] }
  0xde   :  { %833 = vmatpush2.msra.mxu1 %v635_v24  ;;  %774 = vmatpush2.msra.mxu0 %v687_v47  ;;  %v866_v24 = vld [vmem:[#allocation13 + $0x648] sm:$0xff]  ;;  %v980_v47 = vld [vmem:[#allocation13 + $0x790] sm:$0xff] }
  0xdf   :  { %834 = vmatprep.subr.mxu1 %v634_v26  ;;  %775 = vmatprep.subr.mxu0 %v686_v49  ;;  %v864_v26 = vld [vmem:[#allocation13 + $0x638] sm:$0xff]  ;;  %v978_v49 = vld [vmem:[#allocation13 + $0x780] sm:$0xff] }
  0xe0   :  { %835 = vmatpush2.msra.mxu1 %v633_v28  ;;  %776 = vmatpush2.msra.mxu0 %v685_v50  ;;  %v862_v28 = vld [vmem:[#allocation13 + $0x628] sm:$0xff]  ;;  %v977_v50 = vld [vmem:[#allocation13 + $0x778] sm:$0xff] }
  0xe1   :  { %836 = vmatprep.subr.mxu1 %v632_v30  ;;  %777 = vmatprep.subr.mxu0 %v684_v52  ;;  %v860_v30 = vld [vmem:[#allocation13 + $0x618] sm:$0xff]  ;;  %v975_v52 = vld [vmem:[#allocation13 + $0x768] sm:$0xff] }
  0xe2   :  { %837 = vmatpush2.msra.mxu1 %v631_v32  ;;  %778 = vmatpush2.msra.mxu0 %v683_v54  ;;  %v858_v32 = vld [vmem:[#allocation13 + $0x608] sm:$0xff]  ;;  %v973_v54 = vld [vmem:[#allocation13 + $0x758] sm:$0xff] }
  0xe3   :  { %838 = vmatprep.subr.mxu1 %v630_v34  ;;  %889 = vmatprep.subr.mxu0 %v888_v57  ;;  %v993_v34 = vld [vmem:[#allocation13 + $0x7f8] sm:$0xff]  ;;  %v970_v57 = vld [vmem:[#allocation13 + $0x740] sm:$0xff] }
  0xe4   :  { %839 = vmatpush2.msra.mxu1 %v629_v36  ;;  %v991_v36 = vld [vmem:[#allocation13 + $0x7e8] sm:$0xff] }
  0xe5   :  { %840 = vmatprep.subr.mxu1 %v628_v38  ;;  %v989_v38 = vld [vmem:[#allocation13 + $0x7d8] sm:$0xff] }
  0xe6   :  { %841 = vmatpush2.msra.mxu1 %v627_v40  ;;  %v987_v40 = vld [vmem:[#allocation13 + $0x7c8] sm:$0xff] }
  0xe7   :  { %842 = vmatprep.subr.mxu1 %v626_v42  ;;  %v985_v42 = vld [vmem:[#allocation13 + $0x7b8] sm:$0xff] }
  0xe8   :  { %843 = vmatpush2.msra.mxu1 %v625_v44  ;;  %v983_v44 = vld [vmem:[#allocation13 + $0x7a8] sm:$0xff] }
  0xe9   :  { %844 = vmatprep.subr.mxu1 %v624_v46  ;;  %v981_v46 = vld [vmem:[#allocation13 + $0x798] sm:$0xff] }
  0xea   :  { %845 = vmatpush2.msra.mxu1 %v623_v48  ;;  %v979_v48 = vld [vmem:[#allocation13 + $0x788] sm:$0xff] }
  0xeb   :  { %846 = vmatprep.subr.mxu1 %v622_v51  ;;  %v976_v51 = vld [vmem:[#allocation13 + $0x770] sm:$0xff] }
  0xec   :  { %847 = vmatpush2.msra.mxu1 %v621_v53  ;;  %v974_v53 = vld [vmem:[#allocation13 + $0x760] sm:$0xff] }
  0xed   :  { %848 = vmatprep.subr.mxu1 %v620_v55  ;;  %v972_v55 = vld [vmem:[#allocation13 + $0x750] sm:$0xff] }
  0xee   :  { %849 = vmatpush2.msra.mxu1 %v619_v56  ;;  %v971_v56 = vld [vmem:[#allocation13 + $0x748] sm:$0xff] }
 0x12f   :  { %v1856_v58 = vpop.f32.mrf.mxu1 }
 0x131   :  { %v1460_v59 = vpop.f32.mrf.mxu1  ;;  %v1858_v60 = vpop.f32.mrf.mxu0 }
 0x132   :  { %v969_v59 = vld [vmem:[#allocation13 + $0x738] sm:$0xff] }
 0x133   :  { %v1425_v61 = vpop.f32.mrf.mxu0 }
 0x134   :  { %v968_v61 = vld [vmem:[#allocation13 + $0x730] sm:$0xff] }
 0x153   :  { %v435_v62 = vpop.f32.mrf.mxu0 }
 0x155   :  { %v437_v63 = vpop.f32.mrf.mxu0 }
 0x156   :  { %850 = vmatprep.mubr.f32.mxu1 %v437_v63  ;;  %v966_v63 = vld [vmem:[#allocation13 + $0x720] sm:$0xff] }
 0x157   :  { %851 = vmatmul.mubr.f32.vlgmr.msra.gmra.mxu1 %v435_v62  ;;  %v967_v62 = vld [vmem:[#allocation13 + $0x728] sm:$0xff] }
 0x16f   :  { %v582_v1 = vpop.f32.mrf.mxu1 }
 0x171   :  { %v584_v2 = vpop.f32.mrf.mxu1 }
 0x172   :  { %779 = vmatprep.mubr.f32.mxu0 %v584_v2  ;;  %v964_v2 = vld [vmem:[#allocation13 + $0x710] sm:$0xff] }
 0x173   :  { %780 = vmatmul.mubr.f32.vlgmr.msra.gmra.mxu0 %v582_v1  ;;  %v965_v1 = vld [vmem:[#allocation13 + $0x718] sm:$0xff] }
 0x174   :  { %890 = vmatpush1.msra.mxu0 %v887_v3  ;;  %953 = vmatprep.mubr.f32.mxu0 %v1714_v0  ;;  %v963_v3 = vld [vmem:[#allocation13 + $0x708] sm:$0xff] }
 0x175   :  { %891 = vmatprep.subr.mxu0 %v886_v4  ;;  %v962_v4 = vld [vmem:[#allocation13 + $0x700] sm:$0xff] }
 0x176   :  { %892 = vmatpush1.msra.mxu0 %v885_v5 }
 0x177   :  { %893 = vmatprep.subr.mxu0 %v884_v6 }
 0x178   :  { %894 = vmatpush1.msra.mxu0 %v883_v7 }
 0x179   :  { %895 = vmatprep.subr.mxu0 %v882_v8 }
 0x17a   :  { %896 = vmatpush1.msra.mxu0 %v881_v9 }
 0x17b   :  { %897 = vmatprep.subr.mxu0 %v880_v10 }
 0x17c   :  { %898 = vmatpush1.msra.mxu0 %v879_v11 }
 0x17d   :  { %899 = vmatprep.subr.mxu0 %v878_v12 }
 0x17e   :  { %900 = vmatpush1.msra.mxu0 %v877_v13 }
 0x17f   :  { %901 = vmatprep.subr.mxu0 %v876_v14 }
 0x180   :  { %902 = vmatpush1.msra.mxu0 %v875_v15 }
 0x181   :  { %903 = vmatprep.subr.mxu0 %v874_v16 }
 0x182   :  { %904 = vmatpush1.msra.mxu0 %v873_v17 }
 0x183   :  { %905 = vmatprep.subr.mxu0 %v872_v18 }
 0x184   :  { %906 = vmatpush1.msra.mxu0 %v871_v19 }
 0x185   :  { %907 = vmatprep.subr.mxu0 %v870_v20 }
 0x186   :  { %908 = vmatpush1.msra.mxu0 %v869_v21 }
 0x187   :  { %909 = vmatprep.subr.mxu0 %v868_v22 }
 0x188   :  { %910 = vmatpush1.msra.mxu0 %v867_v23 }
 0x189   :  { %911 = vmatprep.subr.mxu0 %v866_v24 }
 0x18a   :  { %912 = vmatpush1.msra.mxu0 %v865_v25 }
 0x18b   :  { %913 = vmatprep.subr.mxu0 %v864_v26 }
 0x18c   :  { %914 = vmatpush1.msra.mxu0 %v863_v27 }
 0x18d   :  { %915 = vmatprep.subr.mxu0 %v862_v28 }
 0x18e   :  { %916 = vmatpush1.msra.mxu0 %v861_v29 }
 0x18f   :  { %917 = vmatprep.subr.mxu0 %v860_v30 }
 0x190   :  { %918 = vmatpush1.msra.mxu0 %v859_v31 }
 0x191   :  { %919 = vmatprep.subr.mxu0 %v858_v32 }
 0x192   :  { %920 = vmatpush1.msra.mxu0 %v857_v33 }
 0x193   :  { %954 = vmatmul.mubr.f32.vlgmr.msra.gmra.mxu0 %v1858_v60  ;;  %994 = vmatprep.subr.mxu0 %v993_v34 }
 0x194   :  { %995 = vmatpush1.msra.mxu0 %v992_v35  ;;  %1058 = vmatprep.mubr.f32.mxu0 %v1714_v0 }
 0x195   :  { %996 = vmatprep.subr.mxu0 %v991_v36 }
 0x196   :  { %997 = vmatpush1.msra.mxu0 %v990_v37 }
 0x197   :  { %998 = vmatprep.subr.mxu0 %v989_v38 }
 0x198   :  { %999 = vmatpush1.msra.mxu0 %v988_v39 }
 0x199   :  { %1000 = vmatprep.subr.mxu0 %v987_v40 }
 0x19a   :  { %1001 = vmatpush1.msra.mxu0 %v986_v41 }
 0x19b   :  { %1002 = vmatprep.subr.mxu0 %v985_v42 }
 0x19c   :  { %1003 = vmatpush1.msra.mxu0 %v984_v43 }
 0x19d   :  { %1004 = vmatprep.subr.mxu0 %v983_v44 }
 0x19e   :  { %1005 = vmatpush1.msra.mxu0 %v982_v45 }
 0x19f   :  { %1006 = vmatprep.subr.mxu0 %v981_v46 }
 0x1a0   :  { %1007 = vmatpush1.msra.mxu0 %v980_v47 }
 0x1a1   :  { %1008 = vmatprep.subr.mxu0 %v979_v48 }
 0x1a2   :  { %1009 = vmatpush1.msra.mxu0 %v978_v49 }
 0x1a3   :  { %1010 = vmatprep.subr.mxu0 %v977_v50 }
 0x1a4   :  { %1011 = vmatpush1.msra.mxu0 %v976_v51 }
 0x1a5   :  { %1012 = vmatprep.subr.mxu0 %v975_v52 }
 0x1a6   :  { %1013 = vmatpush1.msra.mxu0 %v974_v53 }
 0x1a7   :  { %1014 = vmatprep.subr.mxu0 %v973_v54 }
 0x1a8   :  { %1015 = vmatpush1.msra.mxu0 %v972_v55 }
 0x1a9   :  { %1016 = vmatprep.subr.mxu0 %v971_v56 }
 0x1aa   :  { %1017 = vmatpush1.msra.mxu0 %v970_v57 }
 0x1ab   :  { %1018 = vmatprep.subr.mxu0 %v969_v59 }
 0x1ac   :  { %1019 = vmatpush1.msra.mxu0 %v968_v61 }
 0x1ad   :  { %1020 = vmatprep.subr.mxu0 %v967_v62 }
 0x1ae   :  { %1021 = vmatpush1.msra.mxu0 %v966_v63 }
 0x1af   :  { %1022 = vmatprep.subr.mxu0 %v965_v1 }
 0x1b0   :  { %1023 = vmatpush1.msra.mxu0 %v964_v2 }
 0x1b1   :  { %1024 = vmatprep.subr.mxu0 %v963_v3 }
 0x1b2   :  { %1025 = vmatpush1.msra.mxu0 %v962_v4 }
 0x1b3   :  { %1059 = vmatmul.mubr.f32.vlgmr.msra.gmra.mxu0 %v1856_v58 }
 0x1b4   :  { %1591 = shalt.err (!%p1588_p7)  }
 0x1b5   :  { %s1592_s8 = scalar_lea.vmem %s1864_s17, 16  ;;  %s1881_s28 = scalar_lea.vmem %s1864_s17, 64 }
 0x1b6   :  { %p1593_p8 = scmp.ne.s32.totalorder %s1864_s17, %s1592_s8  ;;  %p1597_p9 = scmp.lt.s32.totalorder %s1864_s17, %s1864_s17 }
 0x1b7   :  { %p1598_p10 = scmp.lt.s32.totalorder %s1881_s28, %s1592_s8 }
 0x1b9   :  { %p1599_p11 = por %p1598_p10, %p1597_p9 }
 0x1bb   :  { %p1600_p12 = pnand %p1599_p11, %p1593_p8 }
 0x1bd   :  { %1603 = shalt.err (!%p1600_p12)  }
 0x1be   :  { %123 = dma.hbm_to_vmem [thread:$0]  %s112_s21, 16, %s1864_s17, [#allocation3] }
 0x1bf   :  { %s106_s29 = sld [smem:[#allocation6]]  ;;  %s1717_s30 = smov [#allocation2 + $0x2]  }
 0x1c0   :  { %s1350_s0 = sld [smem:[#allocation5 + $0x80]]  ;;  %s135_s9 = sshll.u32 %s1717_s30, 4  ;;  %s136_s9 = int_to_ptr.vmem [resolvable:$true] %s135_s9 }
 0x1c1   :  { %s1887_s1 = sld [smem:[#allocation6 + $0x80]] }
 0x1c5   :  { %p107_p13 = scmp.lt.s32.totalorder %s106_s29, 7 }
 0x1c6   :  { %p142_p0 = scmp.lt.s32.totalorder %s1350_s0, 7 }
 0x1c7   :  { %s1953_s29 = smov (!%p107_p13, %s106_s29), 7  ;;  %p145_p1 = scmp.lt.s32.totalorder %s1887_s1, 7 }
 0x1c8   :  { %s1349_s7 = sshll.u32 %s1953_s29, 4 }
 0x1c9   :  { %s126_s14 = scalar_lea.hbm %s1938_s2, %s1349_s7 }
 0x1ca   :  { %s1604_s5 = scalar_lea.hbm %s126_s14, 16  ;;  %p1607_p3 = scmp.lt.s32.totalorder %s126_s14, %s1938_s2 }
 0x1cb   :  { %p1605_p2 = scmp.ne.s32.totalorder %s126_s14, %s1604_s5  ;;  %p1608_p4 = scmp.lt.s32.totalorder %s1872_s25, %s1604_s5 }
 0x1cd   :  { %p1609_p5 = por %p1608_p4, %p1607_p3 }
 0x1cf   :  { %p1610_p6 = pnand %p1609_p5, %p1605_p2 }
 0x1d1   :  { %1613 = shalt.err (!%p1610_p6)  }
 0x1d2   :  { %s1614_s15 = scalar_lea.vmem %s136_s9, 16  ;;  %p1619_p8 = scmp.lt.s32.totalorder %s136_s9, %s1864_s17 }
 0x1d3   :  { %p1615_p7 = scmp.ne.s32.totalorder %s136_s9, %s1614_s15  ;;  %p1620_p9 = scmp.lt.s32.totalorder %s1881_s28, %s1614_s15 }
 0x1d5   :  { %p1621_p10 = por %p1620_p9, %p1619_p8 }
 0x1d7   :  { %p1622_p11 = pnand %p1621_p10, %p1615_p7 }
 0x1d9   :  { %1625 = shalt.err (!%p1622_p11)  }
 0x1da   :  { %138 = dma.hbm_to_vmem [thread:$0]  %s126_s14, 16, %s136_s9, [#allocation3] }
 0x1db   :  { %s1955_s0 = smov (!%p142_p0, %s1350_s0), 7  ;;  %s1718_s16 = smov [#allocation2 + $0x1]  }
 0x1dc   :  { %s1352_s4 = sshll.u32 %s1955_s0, 4  ;;  %s159_s18 = sshll.u32 %s1718_s16, 4  ;;  %s160_s18 = int_to_ptr.vmem [resolvable:$true] %s159_s18 }
 0x1dd   :  { %s1343_s21 = scalar_lea.hbm %s1938_s2, %s1352_s4  ;;  %s1719_s23 = smov [#allocation2 + $0x3]  }
 0x1de   :  { %s1344_s22 = scalar_lea.hbm %s1343_s21, 128  ;;  %s174_s24 = sshll.u32 %s1719_s23, 4  ;;  %s175_s24 = int_to_ptr.vmem [resolvable:$true] %s174_s24 }
 0x1df   :  { %s1648_s26 = scalar_lea.hbm %s1343_s21, 144  ;;  %p1629_p13 = scmp.lt.s32.totalorder %s1344_s22, %s1938_s2 }
 0x1e0   :  { %p1627_p12 = scmp.ne.s32.totalorder %s1344_s22, %s1648_s26  ;;  %p1630_p2 = scmp.lt.s32.totalorder %s1872_s25, %s1648_s26 }
 0x1e2   :  { %p1631_p3 = por %p1630_p2, %p1629_p13 }
 0x1e4   :  { %p1632_p0 = pnand %p1631_p3, %p1627_p12 }
 0x1e6   :  { %1635 = shalt.err (!%p1632_p0)  }
 0x1e7   :  { %s1636_s29 = scalar_lea.vmem %s160_s18, 16  ;;  %p1641_p5 = scmp.lt.s32.totalorder %s160_s18, %s1864_s17 }
 0x1e8   :  { %p1637_p4 = scmp.ne.s32.totalorder %s160_s18, %s1636_s29  ;;  %p1642_p6 = scmp.lt.s32.totalorder %s1881_s28, %s1636_s29 }
 0x1ea   :  { %p1643_p7 = por %p1642_p6, %p1641_p5 }
 0x1ec   :  { %p1644_p8 = pnand %p1643_p7, %p1637_p4 }
 0x1ee   :  { %1647 = shalt.err (!%p1644_p8)  }
 0x1ef   :  { %162 = dma.hbm_to_vmem [thread:$0]  %s1344_s22, 16, %s160_s18, [#allocation3] }
 0x1f0   :  { %s1957_s1 = smov (!%p145_p1, %s1887_s1), 7 }
 0x1f1   :  { %s1353_s0 = sshll.u32 %s1957_s1, 4 }
 0x1f2   :  { %s1346_s9 = scalar_lea.hbm %s1938_s2, %s1353_s0 }
 0x1f3   :  { %s1347_s10 = scalar_lea.hbm %s1346_s9, 128  ;;  %s1671_s13 = scalar_lea.hbm %s1346_s9, 144 }
 0x1f4   :  { %p1650_p9 = scmp.ne.s32.totalorder %s1347_s10, %s1671_s13  ;;  %p1652_p10 = scmp.lt.s32.totalorder %s1347_s10, %s1938_s2 }
 0x1f5   :  { %p1653_p11 = scmp.lt.s32.totalorder %s1872_s25, %s1671_s13 }
 0x1f7   :  { %p1654_p12 = por %p1653_p11, %p1652_p10 }
 0x1f9   :  { %p1655_p13 = pnand %p1654_p12, %p1650_p9 }
 0x1fb   :  { %1658 = shalt.err (!%p1655_p13)  }
 0x1fc   :  { %s1659_s6 = scalar_lea.vmem %s175_s24, 16  ;;  %p1664_p2 = scmp.lt.s32.totalorder %s175_s24, %s1864_s17 }
 0x1fd   :  { %p1660_p1 = scmp.ne.s32.totalorder %s175_s24, %s1659_s6  ;;  %p1665_p3 = scmp.lt.s32.totalorder %s1881_s28, %s1659_s6 }
 0x1ff   :  { %p1666_p0 = por %p1665_p3, %p1664_p2 }
 0x201   :  { %p1667_p4 = pnand %p1666_p0, %p1660_p1 }
 0x203   :  { %1670 = shalt.err (!%p1667_p4)  }
 0x204   :  { %177 = dma.hbm_to_vmem [thread:$0]  %s1347_s10, 16, %s175_s24, [#allocation3] }
 0x217   :  { %v852_v6 = vpop.f32.mrf.mxu1 }
 0x219   :  { %v854_v9 = vpop.f32.mrf.mxu1 }
 0x233   :  { %v781_v5 = vpop.f32.mrf.mxu0 }
 0x234   :  { %v853_v10 = vadd.f32 %v852_v6, %v781_v5 }
 0x235   :  { %v783_v7 = vpop.f32.mrf.mxu0 }
 0x236   :  { %v855_v12 = vadd.f32 %v854_v9, %v783_v7 }
 0x253   :  { %v955_v8 = vpop.f32.mrf.mxu0 }
 0x254   :  { %v960_v13 = vadd.f32 %v955_v8, %v853_v10 }
 0x255   :  { %v957_v11 = vpop.f32.mrf.mxu0 }
 0x256   :  { %v961_v15 = vadd.f32 %v957_v11, %v855_v12 }
 0x273   :  { %v1060_v14 = vpop.f32.mrf.mxu0 }
 0x274   :  { %v1921_v16 = vadd.f32 %v1060_v14, %v960_v13 }
 0x275   :  { %v1062_v17 = vpop.f32.mrf.mxu0 }
 0x276   :  { %v1923_v18 = vadd.f32 %v1062_v17, %v961_v15 }
 0x277   :  { %1700 = dma.done.wait [#allocation3], 64 }
 0x278   :  { %1701 = vsyncadd [#allocation3], 4294967232  ;;  %1172 = vmatprep.mubr.f32.mxu1 %v1714_v0  ;;  %1280 = vmatprep.mubr.f32.mxu0 %v1714_v0  ;;  %v1107_v19 = vld [vmem:[#allocation13 + $0xf8] sm:$0xff]  ;;  %v1106_v21 = vld [vmem:[#allocation13 + $0xf0] sm:$0xff]  ;;  %v1073_v5 = vrot.slane %v1856_v58, 6  ;;  %s1720_s25 = smov [#allocation15]  }
 0x279   :  { %v1212_v20 = vld [vmem:[#allocation13 + $0x1f8] sm:$0xff]  ;;  %1108 = vmatprep.subr.mxu1 %v1107_v19  ;;  %v1211_v22 = vld [vmem:[#allocation13 + $0x1f0] sm:$0xff]  ;;  %v1105_v23 = vld [vmem:[#allocation13 + $0xe8] sm:$0xff]  ;;  %s1321_s28 = sshll.u32 %s1720_s25, 4  ;;  %s1322_s28 = int_to_ptr.vmem [resolvable:$true] %s1321_s28 }
 0x27a   :  { %1216 = vmatprep.subr.mxu0 %v1212_v20  ;;  %v1210_v24 = vld [vmem:[#allocation13 + $0x1e8] sm:$0xff]  ;;  %1109 = vmatpush1.msra.mxu1 %v1106_v21  ;;  %v1104_v25 = vld [vmem:[#allocation13 + $0xe0] sm:$0xff]  ;;  %v1103_v27 = vld [vmem:[#allocation13 + $0xd8] sm:$0xff]  ;;  %s1672_s1 = scalar_lea.vmem %s1322_s28, 64  ;;  %p1677_p6 = scmp.lt.s32.totalorder %s1322_s28, %s1322_s28 }
 0x27b   :  { %1217 = vmatpush1.msra.mxu0 %v1211_v22  ;;  %v1209_v26 = vld [vmem:[#allocation13 + $0x1e0] sm:$0xff]  ;;  %1110 = vmatprep.subr.mxu1 %v1105_v23  ;;  %v1208_v28 = vld [vmem:[#allocation13 + $0x1d8] sm:$0xff]  ;;  %v1102_v29 = vld [vmem:[#allocation13 + $0xd0] sm:$0xff]  ;;  %p1673_p5 = scmp.ne.s32.totalorder %s1322_s28, %s1672_s1  ;;  %p1678_p7 = scmp.lt.s32.totalorder %s1672_s1, %s1672_s1 }
 0x27c   :  { %1218 = vmatprep.subr.mxu0 %v1210_v24  ;;  %v1207_v30 = vld [vmem:[#allocation13 + $0x1d0] sm:$0xff]  ;;  %1111 = vmatpush1.msra.mxu1 %v1104_v25  ;;  %v1101_v0 = vld [vmem:[#allocation13 + $0xc8] sm:$0xff]  ;;  %v1100_v32 = vld [vmem:[#allocation13 + $0xc0] sm:$0xff] }
 0x27d   :  { %1219 = vmatpush1.msra.mxu0 %v1209_v26  ;;  %v1206_v31 = vld [vmem:[#allocation13 + $0x1c8] sm:$0xff]  ;;  %1112 = vmatprep.subr.mxu1 %v1103_v27  ;;  %v1205_v33 = vld [vmem:[#allocation13 + $0x1c0] sm:$0xff]  ;;  %v1099_v34 = vld [vmem:[#allocation13 + $0xb8] sm:$0xff]  ;;  %v1291_v27 = vlaneseq  ;;  %p1679_p8 = por %p1678_p7, %p1677_p6 }
 0x27e   :  { %1220 = vmatprep.subr.mxu0 %v1208_v28  ;;  %1113 = vmatpush1.msra.mxu1 %v1102_v29  ;;  %v1204_v35 = vld [vmem:[#allocation13 + $0x1b8] sm:$0xff]  ;;  %v1098_v36 = vld [vmem:[#allocation13 + $0xb0] sm:$0xff]  ;;  %v1097_v38 = vld [vmem:[#allocation13 + $0xa8] sm:$0xff] }
 0x27f   :  { %1221 = vmatpush1.msra.mxu0 %v1207_v30  ;;  %1114 = vmatprep.subr.mxu1 %v1101_v0  ;;  %v1203_v37 = vld [vmem:[#allocation13 + $0x1b0] sm:$0xff]  ;;  %v1202_v39 = vld [vmem:[#allocation13 + $0x1a8] sm:$0xff]  ;;  %v1096_v40 = vld [vmem:[#allocation13 + $0xa0] sm:$0xff]  ;;  %v1292_v28 = vshrl.u32 %v1291_v27, 7  ;;  %p1680_p9 = pnand %p1679_p8, %p1673_p5 }
 0x280   :  { %1222 = vmatprep.subr.mxu0 %v1206_v31  ;;  %1115 = vmatpush1.msra.mxu1 %v1100_v32  ;;  %v1201_v41 = vld [vmem:[#allocation13 + $0x1a0] sm:$0xff]  ;;  %v1095_v42 = vld [vmem:[#allocation13 + $0x98] sm:$0xff]  ;;  %v1094_v44 = vld [vmem:[#allocation13 + $0x90] sm:$0xff] }
 0x281   :  { %1223 = vmatpush1.msra.mxu0 %v1205_v33  ;;  %1116 = vmatprep.subr.mxu1 %v1099_v34  ;;  %v1200_v43 = vld [vmem:[#allocation13 + $0x198] sm:$0xff]  ;;  %v1199_v45 = vld [vmem:[#allocation13 + $0x190] sm:$0xff]  ;;  %v1093_v46 = vld [vmem:[#allocation13 + $0x88] sm:$0xff]  ;;  %v1293_v29 = vsub.s32 0, %v1292_v28  ;;  %v1297_v30 = vsub.s32 1, %v1292_v28 }
 0x282   :  { %1224 = vmatprep.subr.mxu0 %v1204_v35  ;;  %1117 = vmatpush1.msra.mxu1 %v1098_v36  ;;  %v1198_v47 = vld [vmem:[#allocation13 + $0x188] sm:$0xff]  ;;  %v1092_v48 = vld [vmem:[#allocation13 + $0x80] sm:$0xff]  ;;  %v1091_v50 = vld [vmem:[#allocation13 + $0x78] sm:$0xff] }
 0x283   :  { %1225 = vmatpush1.msra.mxu0 %v1203_v37  ;;  %1118 = vmatprep.subr.mxu1 %v1097_v38  ;;  %v1197_v49 = vld [vmem:[#allocation13 + $0x180] sm:$0xff]  ;;  %v1196_v51 = vld [vmem:[#allocation13 + $0x178] sm:$0xff]  ;;  %v1090_v52 = vld [vmem:[#allocation13 + $0x70] sm:$0xff] }
 0x284   :  { %1226 = vmatprep.subr.mxu0 %v1202_v39  ;;  %1119 = vmatpush1.msra.mxu1 %v1096_v40  ;;  %v1195_v53 = vld [vmem:[#allocation13 + $0x170] sm:$0xff]  ;;  %v1089_v54 = vld [vmem:[#allocation13 + $0x68] sm:$0xff]  ;;  %v1088_v56 = vld [vmem:[#allocation13 + $0x60] sm:$0xff] }
 0x285   :  { %1227 = vmatpush1.msra.mxu0 %v1201_v41  ;;  %1120 = vmatprep.subr.mxu1 %v1095_v42  ;;  %v1194_v55 = vld [vmem:[#allocation13 + $0x168] sm:$0xff]  ;;  %v1193_v57 = vld [vmem:[#allocation13 + $0x160] sm:$0xff]  ;;  %v1087_v59 = vld [vmem:[#allocation13 + $0x58] sm:$0xff] }
 0x286   :  { %1228 = vmatprep.subr.mxu0 %v1200_v43  ;;  %1121 = vmatpush1.msra.mxu1 %v1094_v44  ;;  %v1192_v61 = vld [vmem:[#allocation13 + $0x158] sm:$0xff]  ;;  %v1086_v62 = vld [vmem:[#allocation13 + $0x50] sm:$0xff]  ;;  %v1085_v1 = vld [vmem:[#allocation13 + $0x48] sm:$0xff] }
 0x287   :  { %1229 = vmatpush1.msra.mxu0 %v1199_v45  ;;  %1122 = vmatprep.subr.mxu1 %v1093_v46  ;;  %v1191_v63 = vld [vmem:[#allocation13 + $0x150] sm:$0xff]  ;;  %v1190_v2 = vld [vmem:[#allocation13 + $0x148] sm:$0xff]  ;;  %v1084_v3 = vld [vmem:[#allocation13 + $0x40] sm:$0xff] }
 0x288   :  { %1230 = vmatprep.subr.mxu0 %v1198_v47  ;;  %1123 = vmatpush1.msra.mxu1 %v1092_v48  ;;  %v1189_v4 = vld [vmem:[#allocation13 + $0x140] sm:$0xff]  ;;  %v1083_v6 = vld [vmem:[#allocation13 + $0x38] sm:$0xff]  ;;  %v1082_v9 = vld [vmem:[#allocation13 + $0x30] sm:$0xff] }
 0x289   :  { %1231 = vmatpush1.msra.mxu0 %v1197_v49  ;;  %1124 = vmatprep.subr.mxu1 %v1091_v50  ;;  %v1188_v7 = vld [vmem:[#allocation13 + $0x138] sm:$0xff]  ;;  %v1187_v10 = vld [vmem:[#allocation13 + $0x130] sm:$0xff]  ;;  %v1081_v11 = vld [vmem:[#allocation13 + $0x28] sm:$0xff] }
 0x28a   :  { %1232 = vmatprep.subr.mxu0 %v1196_v51  ;;  %1125 = vmatpush1.msra.mxu1 %v1090_v52  ;;  %v1070_v8 = vld [vmem:[#allocation2] sm:$0xf]  ;;  %v1186_v12 = vld [vmem:[#allocation13 + $0x128] sm:$0xff]  ;;  %v1080_v13 = vld [vmem:[#allocation13 + $0x20] sm:$0xff] }
 0x28b   :  { %1233 = vmatpush1.msra.mxu0 %v1195_v53  ;;  %1126 = vmatprep.subr.mxu1 %v1089_v54  ;;  %v1185_v14 = vld [vmem:[#allocation13 + $0x120] sm:$0xff]  ;;  %v1075_v15 = vadd.f32 %v1073_v5, %v1070_v8  ;;  %v1079_v58 = vld [vmem:[#allocation13 + $0x18] sm:$0xff]  ;;  %v1078_v19 = vld [vmem:[#allocation13 + $0x10] sm:$0xff]  ;;  %v1071_v25 = vadd.f32 %v1070_v8, %v1858_v60 }
 0x28c   :  { %1234 = vmatprep.subr.mxu0 %v1194_v55  ;;  %1127 = vmatpush1.msra.mxu1 %v1088_v56  ;;  %v1184_v17 = vld [vmem:[#allocation13 + $0x118] sm:$0xff]  ;;  %v1183_v20 = vld [vmem:[#allocation13 + $0x110] sm:$0xff]  ;;  %v1077_v21 = vld [vmem:[#allocation13 + $0x8] sm:$0xff] }
 0x28d   :  { %1235 = vmatpush1.msra.mxu0 %v1193_v57  ;;  %1128 = vmatprep.subr.mxu1 %v1087_v59  ;;  %v1182_v22 = vld [vmem:[#allocation13 + $0x108] sm:$0xff]  ;;  %v1076_v23 = vld [vmem:[#allocation13] sm:$0xff]  ;;  %v1214_v26 = vrot.slane %v1075_v15, 2  ;;  %v1289_v32 = vld [vmem:[%s1947_s11] sm:$0x3] }
 0x28e   :  { %1236 = vmatprep.subr.mxu0 %v1192_v61  ;;  %1129 = vmatpush1.msra.mxu1 %v1086_v62  ;;  %v1181_v24 = vld [vmem:[#allocation13 + $0x100] sm:$0xff]  ;;  %v1294_v35 = vrot.slane %v1289_v32, %v1293_v29  ;;  %v1298_v37 = vrot.slane %v1289_v32, %v1297_v30 }
 0x28f   :  { %1237 = vmatpush1.msra.mxu0 %v1191_v63  ;;  %1130 = vmatprep.subr.mxu1 %v1085_v1 }
 0x290   :  { %1238 = vmatprep.subr.mxu0 %v1190_v2  ;;  %1131 = vmatpush1.msra.mxu1 %v1084_v3 }
 0x291   :  { %1239 = vmatpush1.msra.mxu0 %v1189_v4  ;;  %1132 = vmatprep.subr.mxu1 %v1083_v6 }
 0x292   :  { %1240 = vmatprep.subr.mxu0 %v1188_v7  ;;  %1133 = vmatpush1.msra.mxu1 %v1082_v9 }
 0x293   :  { %1241 = vmatpush1.msra.mxu0 %v1187_v10  ;;  %1134 = vmatprep.subr.mxu1 %v1081_v11 }
 0x294   :  { %1242 = vmatprep.subr.mxu0 %v1186_v12  ;;  %1135 = vmatpush1.msra.mxu1 %v1080_v13 }
 0x295   :  { %1243 = vmatpush1.msra.mxu0 %v1185_v14  ;;  %1136 = vmatprep.subr.mxu1 %v1079_v58 }
 0x296   :  { %1244 = vmatprep.subr.mxu0 %v1184_v17  ;;  %1137 = vmatpush1.msra.mxu1 %v1078_v19 }
 0x297   :  { %1245 = vmatpush1.msra.mxu0 %v1183_v20  ;;  %1138 = vmatprep.subr.mxu1 %v1077_v21 }
 0x298   :  { %1246 = vmatprep.subr.mxu0 %v1182_v22  ;;  %1139 = vmatpush1.msra.mxu1 %v1076_v23 }
 0x299   :  { %1247 = vmatpush1.msra.mxu0 %v1181_v24  ;;  %1173 = vmatmul.mubr.f32.vlgmr.msra.gmra.mxu1 %v1071_v25 }
 0x29a   :  { %1281 = vmatmul.mubr.f32.vlgmr.msra.gmra.mxu0 %v1214_v26 }
 0x359   :  { %v1174_v0 = vpop.f32.mrf.mxu1 }
 0x35a   :  { %v1282_v31 = vpop.f32.mrf.mxu0  ;;  %v1179_v60 = vadd.f32 %v1174_v0, %v1921_v16 }
 0x35b   :  { %v1176_v33 = vpop.f32.mrf.mxu1 }
 0x35c   :  { %v1287_v34 = vadd.f32 %v1282_v31, %v1179_v60  ;;  %v1180_v36 = vadd.f32 %v1176_v33, %v1923_v18  ;;  %v1284_v38 = vpop.f32.mrf.mxu0 }
 0x35e   :  { %v1288_v39 = vadd.f32 %v1284_v38, %v1180_v36  ;;  %v1301_v40 = vadd.f32 %v1294_v35, %v1287_v34 }
 0x360   :  { %v1302_v41 = vadd.f32 %v1298_v37, %v1288_v39 }
 0x362   :  { %v1305_v42 = vcombine.low %v1301_v40, %v1302_v41 }
 0x364   :  { %1355 = vst.sshfl [vmem:[#allocation15] sm:$0x33 pattern:$0x76325410] %v1305_v42 }
 0x365   :  { %1683 = shalt.err (!%p1680_p9)
}
 0x366   :  { %1324 = dma.vmem_to_hbm [thread:$0]  %s1322_s28, 64, %s1948_s12, [#allocation9]  }
 0x367   :  { %1702 = dma.done.wait [#allocation9], 64  }
 0x368   :  { %1703 = vsyncadd [#allocation9], 4294967232 }
 0x369   :  { %1328 = vsyncpa [#allocation8], 1 }
 0x36a   :  { %1329 = vsyncpa [#allocation11], 1 }
 0x36b   :  { %1330 = vsyncpa [#allocation14], 1 }
 0x36c   :  { %1331 = vsyncpa [#allocation9], 1 }
 0x36d   :  { %1332 = vsyncmov [#allocation3] }
 0x370   :  { %s1333_s15 = vpop.sfrf %1332 }
 0x371   :  { %p1356_p10 = scmp.ne.s32.totalorder %s1333_s15, 0 }
 0x373   :  { %1337 = shalt.err (%p1356_p10)  }

</bundles_post_ra>
